<compile_context>
chip_gen: v7x
topology: tpu7x:2x2x1
jax: 0.10.0
libtpu: 0.0.40
codegen_flags: <defaults>
</compile_context>

<pallas_src>
import jax
import jax.numpy as jnp
from jax.experimental import pallas as pl
from jax.experimental.pallas import tpu as pltpu

# bf16 everywhere (v5e/v6e/v7x): MXU-native, halves HBM traffic of the
# im2col patches (the binding resource).  Accumulation is f32 via
# preferred_element_type; BN/ReLU epilogue and final logits are f32.
COMPUTE_DTYPE = jnp.bfloat16

_K_ALIGN = 16  # bf16 sublane packing (also a multiple of the f32 value 8)


def _round_up(x, m):
    return ((x + m - 1) // m) * m


def _pick_tm(m):
    """Largest lane tile (multiple of 128) dividing m; prefer >=2 grid steps."""
    for c in (1024, 512, 256, 128):
        if m % c == 0 and m // c >= 2:
            return c
    for c in (1024, 512, 256, 128):
        if m % c == 0:
            return c
    return m  # full extent fallback (still a legal block: equals array dim)


# ----------------------------------------------------------------------------
# Kernel 1: fused conv (taps folded into K) + folded BN + ReLU + 2x2 max-pool.
#   patches : (K, 4*TM)  lane order (pool_pos, pixel) for this grid tile
#   w_t     : (Cout, K)  conv weight, K ordered (kh, kw, cin), zero-padded
#   s, b    : (Cout, 1)  folded BN (eval running stats) + conv bias, f32
#   out     : (Cout, TM) pooled, post-ReLU feature map (lane-dense store)
# ----------------------------------------------------------------------------
def _conv_bn_relu_pool_kernel(p_ref, w_ref, s_ref, b_ref, o_ref):
    cout, tm = o_ref.shape
    # One MXU matmul covering all 4 pool-window positions of this lane tile.
    z = jnp.dot(w_ref[...], p_ref[...], preferred_element_type=jnp.float32)
    # Hoisted BN scale/bias broadcast (reused for all 4 chunks).
    s = jnp.broadcast_to(s_ref[...], (cout, tm))
    b = jnp.broadcast_to(b_ref[...], (cout, tm))
    # 128-aligned lane chunks -> per-position BN affine -> max-pool -> ReLU.
    m01 = jnp.maximum(z[:, 0 * tm:1 * tm] * s + b, z[:, 1 * tm:2 * tm] * s + b)
    m23 = jnp.maximum(z[:, 2 * tm:3 * tm] * s + b, z[:, 3 * tm:4 * tm] * s + b)
    out = jnp.maximum(jnp.maximum(m01, m23), 0.0)
    o_ref[...] = out.astype(o_ref.dtype)


def conv_bn_relu_pool(patches, w_t, scale, bias, tm):
    kp, mtot = patches.shape
    m = mtot // 4
    cout = w_t.shape[0]
    nt = m // tm
    return pl.pallas_call(
        _conv_bn_relu_pool_kernel,
        out_shape=jax.ShapeDtypeStruct((cout, m), COMPUTE_DTYPE),
        grid=(nt,),
        in_specs=[
            pl.BlockSpec((kp, 4 * tm), lambda i: (0, i)),   # pipelined patch DMA
            pl.BlockSpec((cout, kp), lambda i: (0, 0)),     # weights resident
            pl.BlockSpec((cout, 1), lambda i: (0, 0)),
            pl.BlockSpec((cout, 1), lambda i: (0, 0)),
        ],
        out_specs=pl.BlockSpec((cout, tm), lambda i: (0, i)),
        compiler_params=pltpu.CompilerParams(
            dimension_semantics=("parallel",),              # megacore on v7x
            vmem_limit_bytes=32 * 1024 * 1024),
    )(patches, w_t, scale, bias)


# ----------------------------------------------------------------------------
# Kernel 2: FC head — out = relu(x @ W1^T + b1) @ W2^T + b2
# ----------------------------------------------------------------------------
def _mlp_kernel(x_ref, w1_ref, b1_ref, w2_ref, b2_ref, o_ref):
    h = jnp.dot(x_ref[...], w1_ref[...],
                preferred_element_type=jnp.float32) + b1_ref[...]
    h = jnp.maximum(h, 0.0)
    o_ref[...] = (jnp.dot(h.astype(w2_ref.dtype), w2_ref[...],
                          preferred_element_type=jnp.float32)
                  + b2_ref[...]).astype(o_ref.dtype)


def mlp_head(x, w1t, b1, w2t, b2):
    n, f = x.shape
    c = w1t.shape[1]
    return pl.pallas_call(
        _mlp_kernel,
        out_shape=jax.ShapeDtypeStruct((n, c), jnp.float32),
        grid=(1,),
        in_specs=[
            pl.BlockSpec((n, f), lambda i: (0, 0)),
            pl.BlockSpec((f, c), lambda i: (0, 0)),
            pl.BlockSpec((1, c), lambda i: (0, 0)),
            pl.BlockSpec((c, c), lambda i: (0, 0)),
            pl.BlockSpec((1, c), lambda i: (0, 0)),
        ],
        out_specs=pl.BlockSpec((n, c), lambda i: (0, 0)),
    )(x, w1t, b1, w2t, b2)


# ----------------------------------------------------------------------------
# Glue (plain JAX): im2col with taps folded into K, pool positions grouped as
# 4 contiguous 128-aligned lane chunks per grid tile; BN folding / weight
# re-layout done once in prepare_params.
# ----------------------------------------------------------------------------
def _im2col_pool_lanes(x_nhwc, tm, k_pad, k=5, pad=2):
    """(N,H,W,C) -> (k_pad, 4*M) with lane order (tile, pool_pos, pixel).

    K ordered (kh, kw, cin); pixel (m) ordered (n, ho, wo); M = N*(H//2)*(W//2).
    """
    n, h, w, c = x_nhwc.shape
    xp = jnp.pad(x_nhwc, ((0, 0), (pad, pad), (pad, pad), (0, 0)))
    taps = [xp[:, kh:kh + h, kw:kw + w, :]
            for kh in range(k) for kw in range(k)]
    p = jnp.concatenate(taps, axis=-1)                  # (N, H, W, K)
    kk = k * k * c
    ho, wo = h // 2, w // 2
    m = n * ho * wo
    p = p.reshape(n, ho, 2, wo, 2, kk)                  # (n, ho, dh, wo, dw, K)
    p = jnp.transpose(p, (5, 0, 1, 3, 2, 4))            # (K, n, ho, wo, dh, dw)
    p = p.reshape(kk, m, 4)
    nt = m // tm
    p = p.reshape(kk, nt, tm, 4)
    p = jnp.transpose(p, (0, 1, 3, 2))                  # (K, tile, pool_pos, TM)
    p = p.reshape(kk, nt * 4 * tm)
    if k_pad > kk:                                      # zero-pad K (exact)
        p = jnp.pad(p, ((0, k_pad - kk), (0, 0)))
    return p


def _fold_bn(conv_b, gamma, beta, mean, var, eps=1e-5):
    scale = gamma / jnp.sqrt(var + eps)
    bias = beta + (conv_b - mean) * scale
    return scale.reshape(-1, 1), bias.reshape(-1, 1)


def _conv_w_t(w_oihw, k_pad):
    # (Cout, Cin, kh, kw) -> (Cout, K) with K ordered (kh, kw, cin), zero-pad K.
    cout, cin, kh, kw = w_oihw.shape
    w = jnp.transpose(w_oihw, (0, 2, 3, 1)).reshape(cout, kh * kw * cin)
    if k_pad > w.shape[1]:
        w = jnp.pad(w, ((0, 0), (0, k_pad - w.shape[1])))
    return w


def prepare_params(params):
    """One-time parameter prep (BN fold, weight re-layout/padding, fc transpose)."""
    s1, b1 = _fold_bn(params["conv1_b"], params["bn1_g"], params["bn1_b"],
                      params["bn1_m"], params["bn1_v"])
    s2, b2 = _fold_bn(params["conv2_b"], params["bn2_g"], params["bn2_b"],
                      params["bn2_m"], params["bn2_v"])
    k1 = _round_up(params["conv1_w"].shape[1] * 25, _K_ALIGN)   # 75 -> 80
    k2 = _round_up(params["conv2_w"].shape[1] * 25, _K_ALIGN)   # 400 -> 400
    return {
        "w1_t": _conv_w_t(params["conv1_w"], k1).astype(COMPUTE_DTYPE),
        "s1": s1, "b1": b1,
        "w2_t": _conv_w_t(params["conv2_w"], k2).astype(COMPUTE_DTYPE),
        "s2": s2, "b2": b2,
        "fc_w_t": params["fc_w"].T.astype(COMPUTE_DTYPE),
        "fc_b": params["fc_b"].reshape(1, -1),
        "fc1_w_t": params["fc1_w"].T.astype(COMPUTE_DTYPE),
        "fc1_b": params["fc1_b"].reshape(1, -1),
    }


@jax.jit
def forward(x_nchw, pp):
    x = jnp.transpose(x_nchw, (0, 2, 3, 1)).astype(COMPUTE_DTYPE)   # NHWC, bf16
    n, h, w, _ = x.shape

    # ----- layer1: conv(3->16,5x5,pad2) + BN + ReLU + maxpool(2x2) (fused) ---
    h1, w1 = h // 2, w // 2
    tm1 = _pick_tm(n * h1 * w1)
    p1 = _im2col_pool_lanes(x, tm1, k_pad=pp["w1_t"].shape[1])
    y1 = conv_bn_relu_pool(p1, pp["w1_t"], pp["s1"], pp["b1"], tm1)  # (16, N*h1*w1)
    y1_nhwc = jnp.transpose(y1.reshape(16, n, h1, w1), (1, 2, 3, 0))

    # ----- layer2: conv(16->32) + BN + ReLU + maxpool (fused) ----------------
    h2, w2 = h1 // 2, w1 // 2
    tm2 = _pick_tm(n * h2 * w2)
    p2 = _im2col_pool_lanes(y1_nhwc, tm2, k_pad=pp["w2_t"].shape[1])
    y2 = conv_bn_relu_pool(p2, pp["w2_t"], pp["s2"], pp["b2"], tm2)  # (32, N*h2*w2)

    # TODO(synk): F.dropout(p=0.25) defaults to training mode (stochastic);
    # applied as identity (eval semantics) to keep the kernel deterministic.

    # Flatten in PyTorch NCHW order (tiny per-image transpose so fc weights
    # keep identical semantics to the reference).
    feat = jnp.transpose(y2.reshape(32, n, h2 * w2), (1, 0, 2)).reshape(n, -1)

    out = mlp_head(feat.astype(COMPUTE_DTYPE),
                   pp["fc_w_t"], pp["fc_b"], pp["fc1_w_t"], pp["fc1_b"])
    return out


def init_params(key, num_classes=10, n_channels=3):
    ks = jax.random.split(key, 16)
    return {
        "conv1_w": 0.1 * jax.random.normal(ks[0], (16, n_channels, 5, 5), jnp.float32),
        "conv1_b": 0.05 * jax.random.normal(ks[1], (16,), jnp.float32),
        "bn1_g": 1.0 + 0.1 * jax.random.normal(ks[2], (16,), jnp.float32),
        "bn1_b": 0.1 * jax.random.normal(ks[3], (16,), jnp.float32),
        "bn1_m": 0.1 * jax.random.normal(ks[4], (16,), jnp.float32),
        "bn1_v": jax.random.uniform(ks[5], (16,), jnp.float32, 0.5, 1.5),
        "conv2_w": 0.05 * jax.random.normal(ks[6], (32, 16, 5, 5), jnp.float32),
        "conv2_b": 0.05 * jax.random.normal(ks[7], (32,), jnp.float32),
        "bn2_g": 1.0 + 0.1 * jax.random.normal(ks[8], (32,), jnp.float32),
        "bn2_b": 0.1 * jax.random.normal(ks[9], (32,), jnp.float32),
        "bn2_m": 0.1 * jax.random.normal(ks[10], (32,), jnp.float32),
        "bn2_v": jax.random.uniform(ks[11], (32,), jnp.float32, 0.5, 1.5),
        "fc_w": 0.02 * jax.random.normal(ks[12], (num_classes, 8 * 8 * 32), jnp.float32),
        "fc_b": 0.05 * jax.random.normal(ks[13], (num_classes,), jnp.float32),
        "fc1_w": 0.1 * jax.random.normal(ks[14], (num_classes, num_classes), jnp.float32),
        "fc1_b": 0.05 * jax.random.normal(ks[15], (num_classes,), jnp.float32),
    }


if __name__ == "__main__":
    key = jax.random.PRNGKey(0)
    k_params, k_x = jax.random.split(key)
    num_classes, n_channels = 10, 3
    params = init_params(k_params, num_classes, n_channels)
    pp = prepare_params(params)

    # The fc layer (8*8*32) fixes the spatial input size at 32x32.
    x = jax.random.normal(k_x, (2, n_channels, 32, 32), jnp.float32)

    out = forward(x, pp)
    out = jax.block_until_ready(out)
    assert out.shape == (2, num_classes)
    assert bool(jnp.all(jnp.isfinite(out)))
    print("KERNEL_OK")
</pallas_src>

<mosaic_0001>
module attributes {stable_mosaic.version = 11 : i64} {
  func.func @_conv_bn_relu_pool_kernel(%arg0: i32, %arg1: memref<80x1024xbf16, #tpu.memory_space<vmem>>, %arg2: memref<16x80xbf16, #tpu.memory_space<vmem>>, %arg3: memref<16x1xf32, #tpu.memory_space<vmem>>, %arg4: memref<16x1xf32, #tpu.memory_space<vmem>>, %arg5: memref<16x256xbf16, #tpu.memory_space<vmem>>) attributes {dimension_semantics = [#tpu.dimension_semantics<parallel>], iteration_bounds = array<i64: 2>, scalar_prefetch = 0 : i64, scratch_operands = 0 : i64, tpu.core_type = #tpu.core_type<tc>, window_params = [{transform_indices = @transform_0, window_bounds = array<i64: 80, 1024>}, {pipeline_mode = #tpu.pipeline_mode<synchronous>, transform_indices = @transform_1, window_bounds = array<i64: 16, 80>}, {pipeline_mode = #tpu.pipeline_mode<synchronous>, transform_indices = @transform_2, window_bounds = array<i64: 16, 1>}, {pipeline_mode = #tpu.pipeline_mode<synchronous>, transform_indices = @transform_3, window_bounds = array<i64: 16, 1>}, {transform_indices = @transform_4, window_bounds = array<i64: 16, 256>}]} {
    %c0 = arith.constant 0 : index
    %c0_0 = arith.constant 0 : index
    %0 = vector.load %arg2[%c0, %c0_0] : memref<16x80xbf16, #tpu.memory_space<vmem>>, vector<16x80xbf16>
    %c0_1 = arith.constant 0 : index
    %c0_2 = arith.constant 0 : index
    %1 = vector.load %arg1[%c0_1, %c0_2] : memref<80x1024xbf16, #tpu.memory_space<vmem>>, vector<80x1024xbf16>
    %cst = arith.constant dense<0.000000e+00> : vector<16x1024xf32>
    %2 = tpu.matmul %0, %1, %cst {dimension_numbers = #tpu.dot_dimension_numbers<[1], [0], [0], [1], [0, 0, 1, 1], [], []>} : vector<16x80xbf16>, vector<80x1024xbf16>, vector<16x1024xf32> -> vector<16x1024xf32>
    %c0_3 = arith.constant 0 : index
    %c0_4 = arith.constant 0 : index
    %3 = vector.load %arg3[%c0_3, %c0_4] : memref<16x1xf32, #tpu.memory_space<vmem>>, vector<16x1xf32>
    %4 = vector.shape_cast %3 : vector<16x1xf32> to vector<16x1xf32>
    %5 = vector.broadcast %4 : vector<16x1xf32> to vector<16x256xf32>
    %c0_5 = arith.constant 0 : index
    %c0_6 = arith.constant 0 : index
    %6 = vector.load %arg4[%c0_5, %c0_6] : memref<16x1xf32, #tpu.memory_space<vmem>>, vector<16x1xf32>
    %7 = vector.shape_cast %6 : vector<16x1xf32> to vector<16x1xf32>
    %8 = vector.broadcast %7 : vector<16x1xf32> to vector<16x256xf32>
    %9 = vector.extract_strided_slice %2 {offsets = [0, 0], sizes = [16, 256], strides = [1, 1]} : vector<16x1024xf32> to vector<16x256xf32>
    %10 = arith.mulf %9, %5 : vector<16x256xf32>
    %11 = arith.addf %10, %8 : vector<16x256xf32>
    %12 = vector.extract_strided_slice %2 {offsets = [0, 256], sizes = [16, 256], strides = [1, 1]} : vector<16x1024xf32> to vector<16x256xf32>
    %13 = arith.mulf %12, %5 : vector<16x256xf32>
    %14 = arith.addf %13, %8 : vector<16x256xf32>
    %15 = arith.maximumf %11, %14 : vector<16x256xf32>
    %16 = vector.extract_strided_slice %2 {offsets = [0, 512], sizes = [16, 256], strides = [1, 1]} : vector<16x1024xf32> to vector<16x256xf32>
    %17 = arith.mulf %16, %5 : vector<16x256xf32>
    %18 = arith.addf %17, %8 : vector<16x256xf32>
    %19 = vector.extract_strided_slice %2 {offsets = [0, 768], sizes = [16, 256], strides = [1, 1]} : vector<16x1024xf32> to vector<16x256xf32>
    %20 = arith.mulf %19, %5 : vector<16x256xf32>
    %21 = arith.addf %20, %8 : vector<16x256xf32>
    %22 = arith.maximumf %18, %21 : vector<16x256xf32>
    %23 = arith.maximumf %15, %22 : vector<16x256xf32>
    %cst_7 = arith.constant 0.000000e+00 : f32
    %24 = vector.broadcast %cst_7 : f32 to vector<16x256xf32>
    %25 = arith.maximumf %23, %24 : vector<16x256xf32>
    %26 = arith.truncf %25 : vector<16x256xf32> to vector<16x256xbf16>
    %c0_8 = arith.constant 0 : index
    %c0_9 = arith.constant 0 : index
    %27 = vector.load %arg5[%c0_8, %c0_9] : memref<16x256xbf16, #tpu.memory_space<vmem>>, vector<16x256xbf16>
    tpu.vector_store %arg5[%c0_8, %c0_9], %26 {strides = array<i32>} : memref<16x256xbf16, #tpu.memory_space<vmem>>, vector<16x256xbf16>,
    return
  }
  func.func @transform_0(%arg0: i32) -> (i32, i32) {
    %c0_i32 = arith.constant 0 : i32
    %c0_i32_0 = arith.constant 0 : i32
    return %c0_i32, %arg0 : i32, i32
  }
  func.func @transform_1(%arg0: i32) -> (i32, i32) {
    %c0_i32 = arith.constant 0 : i32
    %c0_i32_0 = arith.constant 0 : i32
    %c0_i32_1 = arith.constant 0 : i32
    return %c0_i32, %c0_i32_0 : i32, i32
  }
  func.func @transform_2(%arg0: i32) -> (i32, i32) {
    %c0_i32 = arith.constant 0 : i32
    %c0_i32_0 = arith.constant 0 : i32
    %c0_i32_1 = arith.constant 0 : i32
    return %c0_i32, %c0_i32_0 : i32, i32
  }
  func.func @transform_3(%arg0: i32) -> (i32, i32) {
    %c0_i32 = arith.constant 0 : i32
    %c0_i32_0 = arith.constant 0 : i32
    %c0_i32_1 = arith.constant 0 : i32
    return %c0_i32, %c0_i32_0 : i32, i32
  }
  func.func @transform_4(%arg0: i32) -> (i32, i32) {
    %c0_i32 = arith.constant 0 : i32
    %c0_i32_0 = arith.constant 0 : i32
    return %c0_i32, %arg0 : i32, i32
  }
}

module attributes {stable_mosaic.version = 11 : i64} {
  func.func @_conv_bn_relu_pool_kernel(%arg0: i32, %arg1: memref<400x512xbf16, #tpu.memory_space<vmem>>, %arg2: memref<32x400xbf16, #tpu.memory_space<vmem>>, %arg3: memref<32x1xf32, #tpu.memory_space<vmem>>, %arg4: memref<32x1xf32, #tpu.memory_space<vmem>>, %arg5: memref<32x128xbf16, #tpu.memory_space<vmem>>) attributes {dimension_semantics = [#tpu.dimension_semantics<parallel>], iteration_bounds = array<i64: 1>, scalar_prefetch = 0 : i64, scratch_operands = 0 : i64, tpu.core_type = #tpu.core_type<tc>, window_params = [{transform_indices = @transform_0, window_bounds = array<i64: 400, 512>}, {pipeline_mode = #tpu.pipeline_mode<synchronous>, transform_indices = @transform_1, window_bounds = array<i64: 32, 400>}, {pipeline_mode = #tpu.pipeline_mode<synchronous>, transform_indices = @transform_2, window_bounds = array<i64: 32, 1>}, {pipeline_mode = #tpu.pipeline_mode<synchronous>, transform_indices = @transform_3, window_bounds = array<i64: 32, 1>}, {transform_indices = @transform_4, window_bounds = array<i64: 32, 128>}]} {
    %c0 = arith.constant 0 : index
    %c0_0 = arith.constant 0 : index
    %0 = vector.load %arg2[%c0, %c0_0] : memref<32x400xbf16, #tpu.memory_space<vmem>>, vector<32x400xbf16>
    %c0_1 = arith.constant 0 : index
    %c0_2 = arith.constant 0 : index
    %1 = vector.load %arg1[%c0_1, %c0_2] : memref<400x512xbf16, #tpu.memory_space<vmem>>, vector<400x512xbf16>
    %cst = arith.constant dense<0.000000e+00> : vector<32x512xf32>
    %2 = tpu.matmul %0, %1, %cst {dimension_numbers = #tpu.dot_dimension_numbers<[1], [0], [0], [1], [0, 0, 1, 1], [], []>} : vector<32x400xbf16>, vector<400x512xbf16>, vector<32x512xf32> -> vector<32x512xf32>
    %c0_3 = arith.constant 0 : index
    %c0_4 = arith.constant 0 : index
    %3 = vector.load %arg3[%c0_3, %c0_4] : memref<32x1xf32, #tpu.memory_space<vmem>>, vector<32x1xf32>
    %4 = vector.shape_cast %3 : vector<32x1xf32> to vector<32x1xf32>
    %5 = vector.broadcast %4 : vector<32x1xf32> to vector<32x128xf32>
    %c0_5 = arith.constant 0 : index
    %c0_6 = arith.constant 0 : index
    %6 = vector.load %arg4[%c0_5, %c0_6] : memref<32x1xf32, #tpu.memory_space<vmem>>, vector<32x1xf32>
    %7 = vector.shape_cast %6 : vector<32x1xf32> to vector<32x1xf32>
    %8 = vector.broadcast %7 : vector<32x1xf32> to vector<32x128xf32>
    %9 = vector.extract_strided_slice %2 {offsets = [0, 0], sizes = [32, 128], strides = [1, 1]} : vector<32x512xf32> to vector<32x128xf32>
    %10 = arith.mulf %9, %5 : vector<32x128xf32>
    %11 = arith.addf %10, %8 : vector<32x128xf32>
    %12 = vector.extract_strided_slice %2 {offsets = [0, 128], sizes = [32, 128], strides = [1, 1]} : vector<32x512xf32> to vector<32x128xf32>
    %13 = arith.mulf %12, %5 : vector<32x128xf32>
    %14 = arith.addf %13, %8 : vector<32x128xf32>
    %15 = arith.maximumf %11, %14 : vector<32x128xf32>
    %16 = vector.extract_strided_slice %2 {offsets = [0, 256], sizes = [32, 128], strides = [1, 1]} : vector<32x512xf32> to vector<32x128xf32>
    %17 = arith.mulf %16, %5 : vector<32x128xf32>
    %18 = arith.addf %17, %8 : vector<32x128xf32>
    %19 = vector.extract_strided_slice %2 {offsets = [0, 384], sizes = [32, 128], strides = [1, 1]} : vector<32x512xf32> to vector<32x128xf32>
    %20 = arith.mulf %19, %5 : vector<32x128xf32>
    %21 = arith.addf %20, %8 : vector<32x128xf32>
    %22 = arith.maximumf %18, %21 : vector<32x128xf32>
    %23 = arith.maximumf %15, %22 : vector<32x128xf32>
    %cst_7 = arith.constant 0.000000e+00 : f32
    %24 = vector.broadcast %cst_7 : f32 to vector<32x128xf32>
    %25 = arith.maximumf %23, %24 : vector<32x128xf32>
    %26 = arith.truncf %25 : vector<32x128xf32> to vector<32x128xbf16>
    %c0_8 = arith.constant 0 : index
    %c0_9 = arith.constant 0 : index
    %27 = vector.load %arg5[%c0_8, %c0_9] : memref<32x128xbf16, #tpu.memory_space<vmem>>, vector<32x128xbf16>
    tpu.vector_store %arg5[%c0_8, %c0_9], %26 {strides = array<i32>} : memref<32x128xbf16, #tpu.memory_space<vmem>>, vector<32x128xbf16>,
    return
  }
  func.func @transform_0(%arg0: i32) -> (i32, i32) {
    %c0_i32 = arith.constant 0 : i32
    %c0_i32_0 = arith.constant 0 : i32
    return %c0_i32, %arg0 : i32, i32
  }
  func.func @transform_1(%arg0: i32) -> (i32, i32) {
    %c0_i32 = arith.constant 0 : i32
    %c0_i32_0 = arith.constant 0 : i32
    %c0_i32_1 = arith.constant 0 : i32
    return %c0_i32, %c0_i32_0 : i32, i32
  }
  func.func @transform_2(%arg0: i32) -> (i32, i32) {
    %c0_i32 = arith.constant 0 : i32
    %c0_i32_0 = arith.constant 0 : i32
    %c0_i32_1 = arith.constant 0 : i32
    return %c0_i32, %c0_i32_0 : i32, i32
  }
  func.func @transform_3(%arg0: i32) -> (i32, i32) {
    %c0_i32 = arith.constant 0 : i32
    %c0_i32_0 = arith.constant 0 : i32
    %c0_i32_1 = arith.constant 0 : i32
    return %c0_i32, %c0_i32_0 : i32, i32
  }
  func.func @transform_4(%arg0: i32) -> (i32, i32) {
    %c0_i32 = arith.constant 0 : i32
    %c0_i32_0 = arith.constant 0 : i32
    return %c0_i32, %arg0 : i32, i32
  }
}

module attributes {stable_mosaic.version = 11 : i64} {
  func.func @_mlp_kernel(%arg0: i32, %arg1: memref<2x2048xbf16, #tpu.memory_space<vmem>>, %arg2: memref<2048x10xbf16, #tpu.memory_space<vmem>>, %arg3: memref<1x10xf32, #tpu.memory_space<vmem>>, %arg4: memref<10x10xbf16, #tpu.memory_space<vmem>>, %arg5: memref<1x10xf32, #tpu.memory_space<vmem>>, %arg6: memref<2x10xf32, #tpu.memory_space<vmem>>) attributes {dimension_semantics = [#tpu.dimension_semantics<arbitrary>], iteration_bounds = array<i64: 1>, scalar_prefetch = 0 : i64, scratch_operands = 0 : i64, tpu.core_type = #tpu.core_type<tc>, window_params = [{pipeline_mode = #tpu.pipeline_mode<synchronous>, transform_indices = @transform_0, window_bounds = array<i64: 2, 2048>}, {pipeline_mode = #tpu.pipeline_mode<synchronous>, transform_indices = @transform_1, window_bounds = array<i64: 2048, 10>}, {pipeline_mode = #tpu.pipeline_mode<synchronous>, transform_indices = @transform_2, window_bounds = array<i64: 1, 10>}, {pipeline_mode = #tpu.pipeline_mode<synchronous>, transform_indices = @transform_3, window_bounds = array<i64: 10, 10>}, {pipeline_mode = #tpu.pipeline_mode<synchronous>, transform_indices = @transform_4, window_bounds = array<i64: 1, 10>}, {pipeline_mode = #tpu.pipeline_mode<synchronous>, transform_indices = @transform_5, window_bounds = array<i64: 2, 10>}]} {
    %c0 = arith.constant 0 : index
    %c0_0 = arith.constant 0 : index
    %0 = vector.load %arg1[%c0, %c0_0] : memref<2x2048xbf16, #tpu.memory_space<vmem>>, vector<2x2048xbf16>
    %c0_1 = arith.constant 0 : index
    %c0_2 = arith.constant 0 : index
    %1 = vector.load %arg2[%c0_1, %c0_2] : memref<2048x10xbf16, #tpu.memory_space<vmem>>, vector<2048x10xbf16>
    %cst = arith.constant dense<0.000000e+00> : vector<2x10xf32>
    %2 = tpu.matmul %0, %1, %cst {dimension_numbers = #tpu.dot_dimension_numbers<[1], [0], [0], [1], [0, 0, 1, 1], [], []>} : vector<2x2048xbf16>, vector<2048x10xbf16>, vector<2x10xf32> -> vector<2x10xf32>
    %c0_3 = arith.constant 0 : index
    %c0_4 = arith.constant 0 : index
    %3 = vector.load %arg3[%c0_3, %c0_4] : memref<1x10xf32, #tpu.memory_space<vmem>>, vector<1x10xf32>
    %4 = vector.broadcast %3 : vector<1x10xf32> to vector<2x10xf32>
    %5 = arith.addf %2, %4 : vector<2x10xf32>
    %cst_5 = arith.constant 0.000000e+00 : f32
    %6 = vector.broadcast %cst_5 : f32 to vector<2x10xf32>
    %7 = arith.maximumf %5, %6 : vector<2x10xf32>
    %8 = arith.truncf %7 : vector<2x10xf32> to vector<2x10xbf16>
    %c0_6 = arith.constant 0 : index
    %c0_7 = arith.constant 0 : index
    %9 = vector.load %arg4[%c0_6, %c0_7] : memref<10x10xbf16, #tpu.memory_space<vmem>>, vector<10x10xbf16>
    %cst_8 = arith.constant dense<0.000000e+00> : vector<2x10xf32>
    %10 = tpu.matmul %8, %9, %cst_8 {dimension_numbers = #tpu.dot_dimension_numbers<[1], [0], [0], [1], [0, 0, 1, 1], [], []>} : vector<2x10xbf16>, vector<10x10xbf16>, vector<2x10xf32> -> vector<2x10xf32>
    %c0_9 = arith.constant 0 : index
    %c0_10 = arith.constant 0 : index
    %11 = vector.load %arg5[%c0_9, %c0_10] : memref<1x10xf32, #tpu.memory_space<vmem>>, vector<1x10xf32>
    %12 = vector.broadcast %11 : vector<1x10xf32> to vector<2x10xf32>
    %13 = arith.addf %10, %12 : vector<2x10xf32>
    %c0_11 = arith.constant 0 : index
    %c0_12 = arith.constant 0 : index
    %14 = vector.load %arg6[%c0_11, %c0_12] : memref<2x10xf32, #tpu.memory_space<vmem>>, vector<2x10xf32>
    tpu.vector_store %arg6[%c0_11, %c0_12], %13 {strides = array<i32>} : memref<2x10xf32, #tpu.memory_space<vmem>>, vector<2x10xf32>,
    return
  }
  func.func @transform_0(%arg0: i32) -> (i32, i32) {
    %c0_i32 = arith.constant 0 : i32
    %c0_i32_0 = arith.constant 0 : i32
    %c0_i32_1 = arith.constant 0 : i32
    return %c0_i32, %c0_i32_0 : i32, i32
  }
  func.func @transform_1(%arg0: i32) -> (i32, i32) {
    %c0_i32 = arith.constant 0 : i32
    %c0_i32_0 = arith.constant 0 : i32
    %c0_i32_1 = arith.constant 0 : i32
    return %c0_i32, %c0_i32_0 : i32, i32
  }
  func.func @transform_2(%arg0: i32) -> (i32, i32) {
    %c0_i32 = arith.constant 0 : i32
    %c0_i32_0 = arith.constant 0 : i32
    %c0_i32_1 = arith.constant 0 : i32
    return %c0_i32, %c0_i32_0 : i32, i32
  }
  func.func @transform_3(%arg0: i32) -> (i32, i32) {
    %c0_i32 = arith.constant 0 : i32
    %c0_i32_0 = arith.constant 0 : i32
    %c0_i32_1 = arith.constant 0 : i32
    return %c0_i32, %c0_i32_0 : i32, i32
  }
  func.func @transform_4(%arg0: i32) -> (i32, i32) {
    %c0_i32 = arith.constant 0 : i32
    %c0_i32_0 = arith.constant 0 : i32
    %c0_i32_1 = arith.constant 0 : i32
    return %c0_i32, %c0_i32_0 : i32, i32
  }
  func.func @transform_5(%arg0: i32) -> (i32, i32) {
    %c0_i32 = arith.constant 0 : i32
    %c0_i32_0 = arith.constant 0 : i32
    %c0_i32_1 = arith.constant 0 : i32
    return %c0_i32, %c0_i32_0 : i32, i32
  }
}

</mosaic_0001>

<bundles_post_ra>
// kernel: forward.3
= control target key start
LH: loop header
LB: loop body
LE: loop exit
PB: predicated region body
PF: predicated region fallthrough
CT: control target
= control target key end

     0   :  { %s1048_s15 = smov 0   ;;  %s1050_s16 = smov 0   ;;  %s1263_s0 = inlined_call_operand.vmem [shape: bf16[80,2048], index: 0, kind: input, shape index: {}]   ;;  %s1264_s1 = inlined_call_operand.vmem [shape: bf16[16,80], index: 1, kind: input, shape index: {}]   ;;  %s1265_s2 = inlined_call_operand.vmem [shape: f32[16,1], index: 2, kind: input, shape index: {}]   ;;  %s1266_s3 = inlined_call_operand.vmem [shape: f32[16,1], index: 3, kind: input, shape index: {}]   ;;  %s1267_s4 = inlined_call_operand.vmem [shape: bf16[16,512], index: 4, kind: output, shape index: {}]  }
   0x1   :  { %s1052_s17 = smov 0  }
   0x2 LB: > { %s904_s18 = sadd.s32 4294967295, %s1020_s17   ;;  %s1065_s19 = sadd.s32 1, %s1020_s17   ;;  %s1020_s17 = sphi %s1052_s17, %s1271_s17   ;;  %s1016_s16 = sphi %s1050_s16, %s1270_s16   ;;  %s1012_s15 = sphi %s1048_s15, %s1269_s15  }
   0x3   : > { %s18_s20 = ssub.s32 %s1020_s17, %s1065_s19  ;;  %s21_s21 = sadd.s32 1, %s1016_s16 }
   0x4   : > { %p19_p0 = scmp.eq.s32.totalorder %s18_s20, 0  ;;  %p28_p1 = scmp.ne.s32.totalorder %s1016_s16, %s1012_s15 }
   0x5   : > { %p29_p2 = scmp.eq.s32.totalorder %s1020_s17, 0  ;;  %p121_p3 = scmp.eq.s32.totalorder %s904_s18, 1 }
   0x6   : > { %s1076_s22 = scalar_select %p19_p0, %s1016_s16, %s21_s21  }
   0x7   : > { %p30_p4 = por %p29_p2, %p28_p1  ;;  %p1078_p5 = por %p121_p3, %p28_p1 }
   0x8   : > { %p907_p6 = scmp.ge.s32.totalorder %s1020_s17, 2 }
   0xa   : > { %152 = sbr.rel (%p907_p6) target bundleno = 42 (0x2a), region = 28 }
  0x11   : > { %155 = sbr.rel (!%p30_p4) target bundleno = 42 (0x2a), region = 32  ;;  %s157_s24 = sand.u32 (%p30_p4), 1, %s1016_s16  }
  0x12   : > { %s964_s25 = sshll.u32 (%p30_p4), %s1020_s17, 5  ;;  %s968_s26 = smul.u32 (%p30_p4), 320, %s157_s24 }
  0x13   : > { %s1088_s29 = scalar_lea.vmem (%p30_p4), %s1263_s0, %s964_s25 }
  0x14   : > { %v175_v0 = vld [vmem:[%s1088_s29] sm:$0xff] (%p30_p4)  ;;  %v177_v1 = vld [vmem:[%s1088_s29 + $0x8] sm:$0xff] (%p30_p4)  ;;  %v179_v2 = vld [vmem:[%s1088_s29 + $0x10] sm:$0xff] (%p30_p4)  ;;  %s1096_s30 = scalar_lea.vmem (%p30_p4), [#allocation2], %s968_s26 }
  0x15   : > { %v181_v3 = vld [vmem:[%s1088_s29 + $0x18] sm:$0xff] (%p30_p4)  ;;  %v183_v4 = vld [vmem:[%s1088_s29 + $0x40] sm:$0xff] (%p30_p4)  ;;  %v185_v5 = vld [vmem:[%s1088_s29 + $0x48] sm:$0xff] (%p30_p4)  ;;  %176 = vst [vmem:[%s1096_s30] sm:$0xff] (%p30_p4), %v175_v0 }
  0x16   : > { %178 = vst [vmem:[%s1096_s30 + $0x8] sm:$0xff] (%p30_p4), %v177_v1  ;;  %180 = vst [vmem:[%s1096_s30 + $0x10] sm:$0xff] (%p30_p4), %v179_v2  ;;  %v187_v6 = vld [vmem:[%s1088_s29 + $0x50] sm:$0xff] (%p30_p4)  ;;  %v189_v7 = vld [vmem:[%s1088_s29 + $0x58] sm:$0xff] (%p30_p4) }
  0x17   : > { %182 = vst [vmem:[%s1096_s30 + $0x18] sm:$0xff] (%p30_p4), %v181_v3  ;;  %184 = vst [vmem:[%s1096_s30 + $0x20] sm:$0xff] (%p30_p4), %v183_v4  ;;  %v191_v8 = vld [vmem:[%s1088_s29 + $0x80] sm:$0xff] (%p30_p4)  ;;  %v193_v9 = vld [vmem:[%s1088_s29 + $0x88] sm:$0xff] (%p30_p4) }
  0x18   : > { %186 = vst [vmem:[%s1096_s30 + $0x28] sm:$0xff] %v185_v5  ;;  %188 = vst [vmem:[%s1096_s30 + $0x30] sm:$0xff] %v187_v6  ;;  %v195_v10 = vld [vmem:[%s1088_s29 + $0x90] sm:$0xff]  ;;  %v197_v11 = vld [vmem:[%s1088_s29 + $0x98] sm:$0xff] }
  0x19   : > { %190 = vst [vmem:[%s1096_s30 + $0x38] sm:$0xff] %v189_v7  ;;  %192 = vst [vmem:[%s1096_s30 + $0x40] sm:$0xff] %v191_v8  ;;  %v199_v12 = vld [vmem:[%s1088_s29 + $0xc0] sm:$0xff]  ;;  %v201_v13 = vld [vmem:[%s1088_s29 + $0xc8] sm:$0xff] }
  0x1a   : > { %194 = vst [vmem:[%s1096_s30 + $0x48] sm:$0xff] %v193_v9  ;;  %196 = vst [vmem:[%s1096_s30 + $0x50] sm:$0xff] %v195_v10  ;;  %v203_v14 = vld [vmem:[%s1088_s29 + $0xd0] sm:$0xff]  ;;  %v205_v15 = vld [vmem:[%s1088_s29 + $0xd8] sm:$0xff] }
  0x1b   : > { %198 = vst [vmem:[%s1096_s30 + $0x58] sm:$0xff] %v197_v11  ;;  %200 = vst [vmem:[%s1096_s30 + $0x60] sm:$0xff] %v199_v12  ;;  %v207_v16 = vld [vmem:[%s1088_s29 + $0x100] sm:$0xff]  ;;  %v209_v17 = vld [vmem:[%s1088_s29 + $0x108] sm:$0xff] }
  0x1c   : > { %202 = vst [vmem:[%s1096_s30 + $0x68] sm:$0xff] %v201_v13  ;;  %204 = vst [vmem:[%s1096_s30 + $0x70] sm:$0xff] %v203_v14  ;;  %v211_v18 = vld [vmem:[%s1088_s29 + $0x110] sm:$0xff]  ;;  %v213_v19 = vld [vmem:[%s1088_s29 + $0x118] sm:$0xff] }
  0x1d   : > { %206 = vst [vmem:[%s1096_s30 + $0x78] sm:$0xff] %v205_v15  ;;  %208 = vst [vmem:[%s1096_s30 + $0x80] sm:$0xff] %v207_v16  ;;  %v215_v20 = vld [vmem:[%s1088_s29 + $0x140] sm:$0xff]  ;;  %v217_v21 = vld [vmem:[%s1088_s29 + $0x148] sm:$0xff] }
  0x1e   : > { %210 = vst [vmem:[%s1096_s30 + $0x88] sm:$0xff] %v209_v17  ;;  %212 = vst [vmem:[%s1096_s30 + $0x90] sm:$0xff] %v211_v18  ;;  %v219_v22 = vld [vmem:[%s1088_s29 + $0x150] sm:$0xff]  ;;  %v221_v23 = vld [vmem:[%s1088_s29 + $0x158] sm:$0xff] }
  0x1f   : > { %214 = vst [vmem:[%s1096_s30 + $0x98] sm:$0xff] %v213_v19  ;;  %216 = vst [vmem:[%s1096_s30 + $0xa0] sm:$0xff] %v215_v20  ;;  %v223_v24 = vld [vmem:[%s1088_s29 + $0x180] sm:$0xff]  ;;  %v225_v25 = vld [vmem:[%s1088_s29 + $0x188] sm:$0xff] }
  0x20   : > { %218 = vst [vmem:[%s1096_s30 + $0xa8] sm:$0xff] %v217_v21  ;;  %220 = vst [vmem:[%s1096_s30 + $0xb0] sm:$0xff] %v219_v22  ;;  %v227_v26 = vld [vmem:[%s1088_s29 + $0x190] sm:$0xff]  ;;  %v229_v27 = vld [vmem:[%s1088_s29 + $0x198] sm:$0xff] }
  0x21   : > { %222 = vst [vmem:[%s1096_s30 + $0xb8] sm:$0xff] %v221_v23  ;;  %224 = vst [vmem:[%s1096_s30 + $0xc0] sm:$0xff] %v223_v24  ;;  %v231_v28 = vld [vmem:[%s1088_s29 + $0x1c0] sm:$0xff]  ;;  %v233_v29 = vld [vmem:[%s1088_s29 + $0x1c8] sm:$0xff] }
  0x22   : > { %226 = vst [vmem:[%s1096_s30 + $0xc8] sm:$0xff] %v225_v25  ;;  %228 = vst [vmem:[%s1096_s30 + $0xd0] sm:$0xff] %v227_v26  ;;  %v235_v30 = vld [vmem:[%s1088_s29 + $0x1d0] sm:$0xff]  ;;  %v237_v31 = vld [vmem:[%s1088_s29 + $0x1d8] sm:$0xff] }
  0x23   : > { %230 = vst [vmem:[%s1096_s30 + $0xd8] sm:$0xff] %v229_v27  ;;  %232 = vst [vmem:[%s1096_s30 + $0xe0] sm:$0xff] %v231_v28  ;;  %v239_v32 = vld [vmem:[%s1088_s29 + $0x200] sm:$0xff]  ;;  %v241_v33 = vld [vmem:[%s1088_s29 + $0x208] sm:$0xff] }
  0x24   : > { %234 = vst [vmem:[%s1096_s30 + $0xe8] sm:$0xff] %v233_v29  ;;  %236 = vst [vmem:[%s1096_s30 + $0xf0] sm:$0xff] %v235_v30  ;;  %v243_v34 = vld [vmem:[%s1088_s29 + $0x210] sm:$0xff]  ;;  %v245_v35 = vld [vmem:[%s1088_s29 + $0x218] sm:$0xff] }
  0x25   : > { %238 = vst [vmem:[%s1096_s30 + $0xf8] sm:$0xff] %v237_v31  ;;  %240 = vst [vmem:[%s1096_s30 + $0x100] sm:$0xff] %v239_v32  ;;  %v247_v36 = vld [vmem:[%s1088_s29 + $0x240] sm:$0xff]  ;;  %v249_v37 = vld [vmem:[%s1088_s29 + $0x248] sm:$0xff] }
  0x26   : > { %242 = vst [vmem:[%s1096_s30 + $0x108] sm:$0xff] %v241_v33  ;;  %244 = vst [vmem:[%s1096_s30 + $0x110] sm:$0xff] %v243_v34  ;;  %v251_v38 = vld [vmem:[%s1088_s29 + $0x250] sm:$0xff]  ;;  %v253_v39 = vld [vmem:[%s1088_s29 + $0x258] sm:$0xff] }
  0x27   : > { %246 = vst [vmem:[%s1096_s30 + $0x118] sm:$0xff] %v245_v35  ;;  %248 = vst [vmem:[%s1096_s30 + $0x120] sm:$0xff] %v247_v36 }
  0x28   : > { %250 = vst [vmem:[%s1096_s30 + $0x128] sm:$0xff] %v249_v37  ;;  %252 = vst [vmem:[%s1096_s30 + $0x130] sm:$0xff] %v251_v38 }
  0x29   : > { %254 = vst [vmem:[%s1096_s30 + $0x138] sm:$0xff] %v253_v39 }
  0x2a PF: > { %p910_p7 = scmp.ge.s32.totalorder %s1020_s17, 1  ;;  %p259_p8 = scmp.lt.s32.totalorder %s1020_s17, 3 }
  0x2c   : > { %p260_p9 = pnand %p910_p7, %p259_p8 }
  0x2d   : > { %s266_s5 = sand.u32 (!%p260_p9), 1, %s1012_s15   ;;  %v1022_v40 = vmov (!%p260_p9), 0   ;;  %v716_v41 = vld [vmem:[%s1265_s2] sm:$0xff] (!%p260_p9)  ;;  %v717_v43 = vld [vmem:[%s1265_s2 + $0x8] sm:$0xff] (!%p260_p9)  ;;  %vm540_vm0 = vcmask (!%p260_p9), 654336  }
  0x2e   : > { %263 = sbr.rel (%p260_p9) target bundleno = 330 (0x14a), region = 55  ;;  %576 = vmatprep.mubr.bf16.mxu0 (!%p260_p9), %v1022_v40  ;;  %619 = vmatprep.mubr.bf16.mxu1 (!%p260_p9), %v1022_v40  ;;  %v728_v42 = vld [vmem:[%s1266_s3] sm:$0xff] (!%p260_p9)  ;;  %v729_v63 = vld [vmem:[%s1266_s3 + $0x8] sm:$0xff] (!%p260_p9)  ;;  %s911_s25 = sshll.u32 (!%p260_p9), %s266_s5, 4 }
  0x2f   : > { %s969_s6 = smul.u32 (!%p260_p9), 320, %s266_s5  ;;  %995 = vset.pattern.permute.xlu0 (!%p260_p9), %v1022_v40  ;;  %996 = vset.pattern.permute.xlu1 (!%p260_p9), %v1022_v40  ;;  %v997_v29 = vld [vmem:[%s1264_s1] sm:$0xff] (!%p260_p9)   ;;  %s289_s26 = scalar_lea.vmem (!%p260_p9), [#allocation3], %s911_s25 }
  0x30   : > { %720 = vperm.xlu0 (!%p260_p9), %995, %v716_v41   ;;  %732 = vperm.xlu1 (!%p260_p9), %996, %v728_v42  }
  0x31   : > { %s1190_s13 = scalar_lea.vmem (!%p260_p9), [#allocation2], %s969_s6 }
  0x32   : > { %v295_v44 = vld [vmem:[%s1190_s13] sm:$0xff] (!%p260_p9)  ;;  %v296_v46 = vld [vmem:[%s1190_s13 + $0x8] sm:$0xff] (!%p260_p9)  ;;  %v297_v19 = vld [vmem:[%s1190_s13 + $0x10] sm:$0xff] (!%p260_p9) }
  0x33   : > { %v299_v45 = vld [vmem:[%s1190_s13 + $0x20] sm:$0xff] (!%p260_p9)  ;;  %v300_v48 = vld [vmem:[%s1190_s13 + $0x28] sm:$0xff] (!%p260_p9)  ;;  %v301_v20 = vld [vmem:[%s1190_s13 + $0x30] sm:$0xff] (!%p260_p9) }
  0x34   : > { %v914_v47 = vcombine.high (!%p260_p9), %v295_v44, %v299_v45  ;;  %v913_v49 = vcombine.low (!%p260_p9), %v295_v44, %v299_v45  ;;  %v303_v50 = vld [vmem:[%s1190_s13 + $0x40] sm:$0xff] (!%p260_p9)  ;;  %v916_v52 = vcombine.high (!%p260_p9), %v296_v46, %v300_v48  ;;  %v915_v53 = vcombine.low (!%p260_p9), %v296_v46, %v300_v48  ;;  %v304_v55 = vld [vmem:[%s1190_s13 + $0x48] sm:$0xff] (!%p260_p9)  ;;  %725 = vperm.xlu0 (!%p260_p9), %995, %v717_v43   ;;  %v298_v21 = vld [vmem:[%s1190_s13 + $0x18] sm:$0xff] (!%p260_p9) }
  0x35   : > { %v307_v51 = vld [vmem:[%s1190_s13 + $0x60] sm:$0xff]  ;;  %v308_v56 = vld [vmem:[%s1190_s13 + $0x68] sm:$0xff]  ;;  %737 = vperm.xlu1 %996, %v729_v63   ;;  %v302_v22 = vld [vmem:[%s1190_s13 + $0x38] sm:$0xff]  ;;  %v918_v25 = vcombine.high %v297_v19, %v301_v20  ;;  %v917_v32 = vcombine.low %v297_v19, %v301_v20  ;;  %s967_s15 = sshll.u32 (%p1078_p5), %s904_s18, 3 }
  0x36   : > { %v922_v54 = vcombine.high %v303_v50, %v307_v51  ;;  %v311_v57 = vld [vmem:[%s1190_s13 + $0x80] sm:$0xff]  ;;  %544 = vmatprep.subr.bf16.mxu0 %v914_v47  ;;  %v924_v58 = vcombine.high %v304_v55, %v308_v56  ;;  %v312_v60 = vld [vmem:[%s1190_s13 + $0x88] sm:$0xff]  ;;  %587 = vmatprep.subr.bf16.mxu1 %v916_v52  ;;  %v921_v62 = vcombine.low %v303_v50, %v307_v51  ;;  %v305_v27 = vld [vmem:[%s1190_s13 + $0x50] sm:$0xff]  ;;  %s811_s29 = scalar_lea.vmem (%p1078_p5), %s1267_s4, %s967_s15 }
  0x37   : > { %v315_v59 = vld [vmem:[%s1190_s13 + $0xa0] sm:$0xff]  ;;  %v316_v61 = vld [vmem:[%s1190_s13 + $0xa8] sm:$0xff]  ;;  %545 = vmatpush1.bf16.msra.mxu0 %v913_v49  ;;  %588 = vmatpush1.bf16.msra.mxu1 %v915_v53  ;;  %v923_v0 = vcombine.low %v304_v55, %v308_v56  ;;  %v920_v26 = vcombine.high %v298_v21, %v302_v22  ;;  %v309_v28 = vld [vmem:[%s1190_s13 + $0x70] sm:$0xff]  ;;  %v919_v33 = vcombine.low %v298_v21, %v302_v22 }
  0x38   : > { %546 = vmatprep.subr.bf16.mxu0 %v922_v54  ;;  %v930_v1 = vcombine.high %v311_v57, %v315_v59  ;;  %589 = vmatprep.subr.bf16.mxu1 %v924_v58  ;;  %v932_v2 = vcombine.high %v312_v60, %v316_v61  ;;  %v319_v3 = vld [vmem:[%s1190_s13 + $0xc0] sm:$0xff]  ;;  %v320_v5 = vld [vmem:[%s1190_s13 + $0xc8] sm:$0xff]  ;;  %v929_v7 = vcombine.low %v311_v57, %v315_v59  ;;  %v306_v30 = vld [vmem:[%s1190_s13 + $0x58] sm:$0xff] }
  0x39   : > { %v323_v4 = vld [vmem:[%s1190_s13 + $0xe0] sm:$0xff]  ;;  %v324_v6 = vld [vmem:[%s1190_s13 + $0xe8] sm:$0xff]  ;;  %v931_v8 = vcombine.low %v312_v60, %v316_v61  ;;  %v310_v31 = vld [vmem:[%s1190_s13 + $0x78] sm:$0xff]  ;;  %v926_v34 = vcombine.high %v305_v27, %v309_v28  ;;  %v925_v41 = vcombine.low %v305_v27, %v309_v28 }
  0x3a   : > { %v938_v9 = vcombine.high %v319_v3, %v323_v4  ;;  %v940_v10 = vcombine.high %v320_v5, %v324_v6  ;;  %v327_v11 = vld [vmem:[%s1190_s13 + $0x100] sm:$0xff]  ;;  %v328_v13 = vld [vmem:[%s1190_s13 + $0x108] sm:$0xff]  ;;  %v937_v15 = vcombine.low %v319_v3, %v323_v4  ;;  %v939_v16 = vcombine.low %v320_v5, %v324_v6  ;;  %v313_v36 = vld [vmem:[%s1190_s13 + $0x90] sm:$0xff] }
  0x3b   : > { %547 = vmatpush1.bf16.msra.mxu0 %v921_v62  ;;  %590 = vmatpush1.bf16.msra.mxu1 %v923_v0  ;;  %v331_v12 = vld [vmem:[%s1190_s13 + $0x120] sm:$0xff]  ;;  %v332_v14 = vld [vmem:[%s1190_s13 + $0x128] sm:$0xff]  ;;  %v928_v35 = vcombine.high %v306_v30, %v310_v31  ;;  %v317_v37 = vld [vmem:[%s1190_s13 + $0xb0] sm:$0xff]  ;;  %v927_v42 = vcombine.low %v306_v30, %v310_v31 }
  0x3c   : > { %548 = vmatprep.subr.bf16.mxu0 %v930_v1  ;;  %591 = vmatprep.subr.bf16.mxu1 %v932_v2  ;;  %v946_v17 = vcombine.high %v327_v11, %v331_v12  ;;  %v948_v18 = vcombine.high %v328_v13, %v332_v14  ;;  %v945_v23 = vcombine.low %v327_v11, %v331_v12  ;;  %v314_v38 = vld [vmem:[%s1190_s13 + $0x98] sm:$0xff]  ;;  %v321_v45 = vld [vmem:[%s1190_s13 + $0xd0] sm:$0xff] }
  0x3d   : > { %v947_v24 = vcombine.low %v328_v13, %v332_v14  ;;  %v318_v39 = vld [vmem:[%s1190_s13 + $0xb8] sm:$0xff]  ;;  %v934_v43 = vcombine.high %v313_v36, %v317_v37  ;;  %v325_v46 = vld [vmem:[%s1190_s13 + $0xf0] sm:$0xff]  ;;  %v933_v49 = vcombine.low %v313_v36, %v317_v37 }
  0x3e   : > { %v936_v44 = vcombine.high %v314_v38, %v318_v39  ;;  %v322_v47 = vld [vmem:[%s1190_s13 + $0xd8] sm:$0xff]  ;;  %v935_v50 = vcombine.low %v314_v38, %v318_v39  ;;  %v942_v51 = vcombine.high %v321_v45, %v325_v46  ;;  %v329_v53 = vld [vmem:[%s1190_s13 + $0x110] sm:$0xff]  ;;  %v941_v57 = vcombine.low %v321_v45, %v325_v46 }
  0x3f   : > { %549 = vmatpush1.bf16.msra.mxu0 %v929_v7  ;;  %592 = vmatpush1.bf16.msra.mxu1 %v931_v8  ;;  %v326_v48 = vld [vmem:[%s1190_s13 + $0xf8] sm:$0xff]  ;;  %v333_v54 = vld [vmem:[%s1190_s13 + $0x130] sm:$0xff] }
  0x40   : > { %550 = vmatprep.subr.bf16.mxu0 %v938_v9  ;;  %593 = vmatprep.subr.bf16.mxu1 %v940_v10  ;;  %v944_v52 = vcombine.high %v322_v47, %v326_v48  ;;  %v330_v55 = vld [vmem:[%s1190_s13 + $0x118] sm:$0xff]  ;;  %v943_v58 = vcombine.low %v322_v47, %v326_v48  ;;  %v950_v59 = vcombine.high %v329_v53, %v333_v54 }
  0x41   : > { %v334_v56 = vld [vmem:[%s1190_s13 + $0x138] sm:$0xff]  ;;  %v949_v60 = vcombine.low %v329_v53, %v333_v54 }
  0x42   : > { %v951_v61 = vcombine.low %v330_v55, %v334_v56 }
  0x43   : > { %551 = vmatpush1.bf16.msra.mxu0 %v937_v15  ;;  %594 = vmatpush1.bf16.msra.mxu1 %v939_v16 }
  0x44   : > { %552 = vmatprep.subr.bf16.mxu0 %v946_v17  ;;  %595 = vmatprep.subr.bf16.mxu1 %v948_v18 }
  0x47   : > { %553 = vmatpush1.bf16.msra.mxu0 %v945_v23  ;;  %596 = vmatpush1.bf16.msra.mxu1 %v947_v24 }
  0x48   : > { %630 = vmatprep.subr.bf16.mxu0 %v918_v25  ;;  %673 = vmatprep.subr.bf16.mxu1 %v920_v26 }
  0x4a   : > { %953 = vmatmul.mubr.msk.bf16.vlgmr.msra.gmra.mrb[0].mxu0 %vm540_vm0, %v997_v29  ;;  %954 = vmatmul.mubr.msk.bf16.vlgmr.msra.gmra.mrb[0].mxu1 %vm540_vm0, %v997_v29 }
  0x4b   : > { %631 = vmatpush1.bf16.msra.mxu0 %v917_v32  ;;  %674 = vmatpush1.bf16.msra.mxu1 %v919_v33 }
  0x4c   : > { %632 = vmatprep.subr.bf16.mxu0 %v926_v34  ;;  %675 = vmatprep.subr.bf16.mxu1 %v928_v35 }
  0x4d   : > { %662 = vmatprep.mubr.bf16.mxu0 %v1022_v40  ;;  %705 = vmatprep.mubr.bf16.mxu1 %v1022_v40  ;;  %v952_v40 = vcombine.high %v330_v55, %v334_v56 }
  0x4f   : > { %633 = vmatpush1.bf16.msra.mxu0 %v925_v41  ;;  %676 = vmatpush1.bf16.msra.mxu1 %v927_v42 }
  0x50   : > { %634 = vmatprep.subr.bf16.mxu0 %v934_v43  ;;  %677 = vmatprep.subr.bf16.mxu1 %v936_v44 }
  0x53   : > { %635 = vmatpush1.bf16.msra.mxu0 %v933_v49  ;;  %678 = vmatpush1.bf16.msra.mxu1 %v935_v50 }
  0x54   : > { %636 = vmatprep.subr.bf16.mxu0 %v942_v51  ;;  %679 = vmatprep.subr.bf16.mxu1 %v944_v52 }
  0x57   : > { %637 = vmatpush1.bf16.msra.mxu0 %v941_v57  ;;  %680 = vmatpush1.bf16.msra.mxu1 %v943_v58 }
  0x58   : > { %638 = vmatprep.subr.bf16.mxu0 %v950_v59  ;;  %681 = vmatprep.subr.bf16.mxu1 %v952_v40 }
  0x5b   : > { %639 = vmatpush1.bf16.msra.mxu0 %v949_v60  ;;  %682 = vmatpush1.bf16.msra.mxu1 %v951_v61 }
  0x5e   : > { %955 = vmatmul.mubr.msk.bf16.vlgmr.msra.gmra.mrb[4].mxu0 %vm540_vm0, %v997_v29  ;;  %956 = vmatmul.mubr.msk.bf16.vlgmr.msra.gmra.mrb[4].mxu1 %vm540_vm0, %v997_v29 }
  0xaf   : > { %v721_v62 = vpop.permute.xlu0 %720  ;;  %v733_v63 = vpop.permute.xlu1 %732 }
  0xb3   : > { %v726_v0 = vpop.permute.xlu0 %725 }
  0xb4   : > { %v738_v2 = vpop.permute.xlu1 %737 }
 0x11d   : > { %v578_v1 = vpop.f32.mrb[0].mxu0  ;;  %v621_v4 = vpop.f32.mrb[0].mxu1 }
 0x11e   : > { %v740_v3 = vmul.f32 %v721_v62, %v578_v1  ;;  %v580_v5 = vpop.f32.mrb[1].mxu0  ;;  %v748_v6 = vmul.f32 %v721_v62, %v621_v4  ;;  %v623_v8 = vpop.f32.mrb[1].mxu1 }
 0x11f   : > { %v741_v7 = vmul.f32 %v721_v62, %v580_v5  ;;  %v582_v9 = vpop.f32.mrb[2].mxu0  ;;  %v749_v11 = vmul.f32 %v721_v62, %v623_v8  ;;  %v625_v13 = vpop.f32.mrb[2].mxu1 }
 0x120   : > { %v744_v10 = vadd.f32 %v740_v3, %v733_v63  ;;  %v742_v12 = vmul.f32 %v726_v0, %v582_v9  ;;  %v584_v14 = vpop.f32.mrb[3].mxu0  ;;  %v752_v15 = vadd.f32 %v748_v6, %v733_v63  ;;  %v750_v17 = vmul.f32 %v726_v0, %v625_v13  ;;  %v627_v19 = vpop.f32.mrb[3].mxu1 }
 0x121   : > { %v745_v16 = vadd.f32 %v741_v7, %v733_v63  ;;  %v743_v18 = vmul.f32 %v726_v0, %v584_v14  ;;  %v753_v20 = vadd.f32 %v749_v11, %v733_v63  ;;  %v751_v21 = vmul.f32 %v726_v0, %v627_v19 }
 0x122   : > { %v746_v22 = vadd.f32 %v742_v12, %v738_v2  ;;  %v756_v23 = vmax.f32 %v744_v10, %v752_v15  ;;  %v754_v24 = vadd.f32 %v750_v17, %v738_v2 }
 0x123   : > { %v747_v25 = vadd.f32 %v743_v18, %v738_v2  ;;  %v757_v26 = vmax.f32 %v745_v16, %v753_v20  ;;  %v755_v27 = vadd.f32 %v751_v21, %v738_v2 }
 0x124   : > { %v758_v28 = vmax.f32 %v746_v22, %v754_v24 }
 0x125   : > { %v759_v29 = vmax.f32 %v747_v25, %v755_v27 }
 0x131   : > { %v664_v30 = vpop.f32.mrb[4].mxu0  ;;  %v707_v32 = vpop.f32.mrb[4].mxu1 }
 0x132   : > { %v760_v31 = vmul.f32 %v721_v62, %v664_v30  ;;  %v666_v33 = vpop.f32.mrb[5].mxu0  ;;  %v768_v34 = vmul.f32 %v721_v62, %v707_v32  ;;  %v709_v36 = vpop.f32.mrb[5].mxu1 }
 0x133   : > { %v761_v35 = vmul.f32 %v721_v62, %v666_v33  ;;  %v668_v37 = vpop.f32.mrb[6].mxu0  ;;  %v769_v39 = vmul.f32 %v721_v62, %v709_v36  ;;  %v711_v42 = vpop.f32.mrb[6].mxu1 }
 0x134   : > { %v764_v38 = vadd.f32 %v760_v31, %v733_v63  ;;  %v762_v41 = vmul.f32 %v726_v0, %v668_v37  ;;  %v670_v43 = vpop.f32.mrb[7].mxu0  ;;  %v772_v44 = vadd.f32 %v768_v34, %v733_v63  ;;  %v770_v46 = vmul.f32 %v726_v0, %v711_v42  ;;  %v713_v48 = vpop.f32.mrb[7].mxu1 }
 0x135   : > { %v765_v45 = vadd.f32 %v761_v35, %v733_v63  ;;  %v763_v47 = vmul.f32 %v726_v0, %v670_v43  ;;  %v773_v49 = vadd.f32 %v769_v39, %v733_v63  ;;  %v771_v51 = vmul.f32 %v726_v0, %v713_v48 }
 0x136   : > { %v766_v50 = vadd.f32 %v762_v41, %v738_v2  ;;  %v776_v52 = vmax.f32 %v764_v38, %v772_v44  ;;  %v774_v53 = vadd.f32 %v770_v46, %v738_v2 }
 0x137   : > { %v767_v54 = vadd.f32 %v763_v47, %v738_v2  ;;  %v777_v55 = vmax.f32 %v765_v45, %v773_v49  ;;  %v775_v56 = vadd.f32 %v771_v51, %v738_v2 }
 0x138   : > { %v780_v57 = vmax.f32 %v756_v23, %v776_v52  ;;  %v778_v58 = vmax.f32 %v766_v50, %v774_v53 }
 0x139   : > { %v781_v59 = vmax.f32 %v757_v26, %v777_v55  ;;  %v779_v40 = vmax.f32 %v767_v54, %v775_v56 }
 0x13a   : > { %v784_v60 = vmax.f32 %v780_v57, 0.0  ;;  %v782_v61 = vmax.f32 %v758_v28, %v778_v58 }
 0x13b   : > { %v785_v62 = vmax.f32 %v781_v59, 0.0  ;;  %v783_v1 = vmax.f32 %v759_v29, %v779_v40  ;;  %808 = sbr.rel (!%p1078_p5) target bundleno = 330 (0x14a), region = 63 }
 0x13c   : > { %v786_v3 = vmax.f32 %v782_v61, 0.0 }
 0x13d   : > { %v965_v4 = vpack.c.bf16 %v785_v62, %v784_v60  ;;  %v787_v63 = vmax.f32 %v783_v1, 0.0 }
 0x13f   : > { %800 = vst [vmem:[%s289_s26] sm:$0xff] %v965_v4  ;;  %v966_v0 = vpack.c.bf16 %v787_v63, %v786_v3 }
 0x141   : > { %801 = vst [vmem:[%s289_s26 + $0x8] sm:$0xff] %v966_v0 }
 0x146   : > { %v841_v2 = vld [vmem:[%s289_s26] sm:$0xff] }
 0x147   : > { %842 = vst [vmem:[%s811_s29] sm:$0xff] %v841_v2 }
 0x148   : > { %v843_v5 = vld [vmem:[%s289_s26 + $0x8] sm:$0xff] }
 0x149   : > { %844 = vst [vmem:[%s811_s29 + $0x10] sm:$0xff] %v843_v5 }
 0x14a PF: > { %p11_p10 = scmp.ge.s32.totalorder %s1065_s19, 4   ;;  %s1269_s15 = smov %s1016_s16 }
 0x14b   : > { %s1270_s16 = smov %s1076_s22  ;;  %s1271_s17 = smov %s1065_s19 }
 0x14c   :  { %13 = sbr.rel (!%p11_p10) target bundleno = 2 (0x2), region = 132 }

// kernel: forward.4
= control target key start
LH: loop header
LB: loop body
LE: loop exit
PB: predicated region body
PF: predicated region fallthrough
CT: control target
= control target key end

     0   :  { %v1315_v1 = vmov 0   ;;  %vm664_vm0 = vcmask 130048   ;;  %s1699_s0 = inlined_call_operand.vmem [shape: bf16[400,512], index: 0, kind: input, shape index: {}]   ;;  %s1700_s1 = inlined_call_operand.vmem [shape: bf16[32,400], index: 1, kind: input, shape index: {}]   ;;  %s1701_s2 = inlined_call_operand.vmem [shape: f32[32,1], index: 2, kind: input, shape index: {}]   ;;  %s1702_s3 = inlined_call_operand.vmem [shape: f32[32,1], index: 3, kind: input, shape index: {}]   ;;  %s1703_s4 = inlined_call_operand.vmem [shape: bf16[32,128], index: 4, kind: output, shape index: {}]  }
   0x1   :  { %v1153_v0 = vld [vmem:[%s1699_s0 + $0x4] ss:$16 sps:$4 sm:$0xff]   ;;  %1152 = vset.pattern.permute.xlu1 %v1315_v1  ;;  %1151 = vset.pattern.permute.xlu0 %v1315_v1  ;;  %v1155_v2 = vld [vmem:[%s1699_s0 + $0xc] ss:$16 sps:$4 sm:$0xff]   ;;  %v1157_v3 = vld [vmem:[%s1699_s0] ss:$16 sps:$4 sm:$0xff]  }
   0x2   :  { %671 = vmatprep.subr.bf16.mxu0 %v1153_v0  ;;  %v1158_v4 = vld [vmem:[%s1699_s0 + $0x8] ss:$16 sps:$4 sm:$0xff]   ;;  %777 = vmatprep.subr.bf16.mxu1 %v1155_v2  ;;  %v1159_v5 = vld [vmem:[%s1699_s0 + $0x24] ss:$16 sps:$4 sm:$0xff]   ;;  %v1161_v6 = vld [vmem:[%s1699_s0 + $0x2c] ss:$16 sps:$4 sm:$0xff]  }
   0x3   :  { %672 = vmatpush1.bf16.msra.mxu0 %v1157_v3  ;;  %778 = vmatpush1.bf16.msra.mxu1 %v1158_v4  ;;  %v1163_v7 = vld [vmem:[%s1699_s0 + $0x20] ss:$16 sps:$4 sm:$0xff]   ;;  %v1164_v8 = vld [vmem:[%s1699_s0 + $0x28] ss:$16 sps:$4 sm:$0xff]   ;;  %v1165_v9 = vld [vmem:[%s1699_s0 + $0x44] ss:$16 sps:$4 sm:$0xff]  }
   0x4   :  { %673 = vmatprep.subr.bf16.mxu0 %v1159_v5  ;;  %779 = vmatprep.subr.bf16.mxu1 %v1161_v6  ;;  %v1167_v10 = vld [vmem:[%s1699_s0 + $0x4c] ss:$16 sps:$4 sm:$0xff]   ;;  %v1169_v11 = vld [vmem:[%s1699_s0 + $0x40] ss:$16 sps:$4 sm:$0xff]   ;;  %v1170_v12 = vld [vmem:[%s1699_s0 + $0x48] ss:$16 sps:$4 sm:$0xff]  }
   0x5   :  { %v1171_v13 = vld [vmem:[%s1699_s0 + $0x64] ss:$16 sps:$4 sm:$0xff]   ;;  %v1173_v14 = vld [vmem:[%s1699_s0 + $0x6c] ss:$16 sps:$4 sm:$0xff]   ;;  %v1175_v15 = vld [vmem:[%s1699_s0 + $0x60] ss:$16 sps:$4 sm:$0xff]  }
   0x6   :  { %v1176_v16 = vld [vmem:[%s1699_s0 + $0x68] ss:$16 sps:$4 sm:$0xff]   ;;  %v1177_v17 = vld [vmem:[%s1699_s0 + $0x84] ss:$16 sps:$4 sm:$0xff]   ;;  %v1179_v18 = vld [vmem:[%s1699_s0 + $0x8c] ss:$16 sps:$4 sm:$0xff]  }
   0x7   :  { %674 = vmatpush1.bf16.msra.mxu0 %v1163_v7  ;;  %780 = vmatpush1.bf16.msra.mxu1 %v1164_v8  ;;  %v1181_v19 = vld [vmem:[%s1699_s0 + $0x80] ss:$16 sps:$4 sm:$0xff]   ;;  %v1182_v20 = vld [vmem:[%s1699_s0 + $0x88] ss:$16 sps:$4 sm:$0xff]   ;;  %v1183_v21 = vld [vmem:[%s1699_s0 + $0xa4] ss:$16 sps:$4 sm:$0xff]  }
   0x8   :  { %675 = vmatprep.subr.bf16.mxu0 %v1165_v9  ;;  %781 = vmatprep.subr.bf16.mxu1 %v1167_v10  ;;  %v1185_v22 = vld [vmem:[%s1699_s0 + $0xac] ss:$16 sps:$4 sm:$0xff]   ;;  %v1187_v23 = vld [vmem:[%s1699_s0 + $0xa0] ss:$16 sps:$4 sm:$0xff]   ;;  %v1188_v24 = vld [vmem:[%s1699_s0 + $0xa8] ss:$16 sps:$4 sm:$0xff]  }
   0x9   :  { %v1189_v25 = vld [vmem:[%s1699_s0 + $0xc4] ss:$16 sps:$4 sm:$0xff]   ;;  %v1191_v26 = vld [vmem:[%s1699_s0 + $0xcc] ss:$16 sps:$4 sm:$0xff]   ;;  %v1193_v27 = vld [vmem:[%s1699_s0 + $0xc0] ss:$16 sps:$4 sm:$0xff]  }
   0xa   :  { %v1194_v28 = vld [vmem:[%s1699_s0 + $0xc8] ss:$16 sps:$4 sm:$0xff]   ;;  %v1195_v29 = vld [vmem:[%s1699_s0 + $0xe4] ss:$16 sps:$4 sm:$0xff]   ;;  %v1197_v30 = vld [vmem:[%s1699_s0 + $0xec] ss:$16 sps:$4 sm:$0xff]  }
   0xb   :  { %676 = vmatpush1.bf16.msra.mxu0 %v1169_v11  ;;  %782 = vmatpush1.bf16.msra.mxu1 %v1170_v12  ;;  %v1199_v31 = vld [vmem:[%s1699_s0 + $0xe0] ss:$16 sps:$4 sm:$0xff]   ;;  %v1200_v32 = vld [vmem:[%s1699_s0 + $0xe8] ss:$16 sps:$4 sm:$0xff]   ;;  %v1201_v33 = vld [vmem:[%s1699_s0 + $0x104] ss:$16 sps:$4 sm:$0xff]  }
   0xc   :  { %677 = vmatprep.subr.bf16.mxu0 %v1171_v13  ;;  %783 = vmatprep.subr.bf16.mxu1 %v1173_v14  ;;  %v1203_v34 = vld [vmem:[%s1699_s0 + $0x10c] ss:$16 sps:$4 sm:$0xff]   ;;  %v1205_v35 = vld [vmem:[%s1699_s0 + $0x100] ss:$16 sps:$4 sm:$0xff]   ;;  %v1206_v36 = vld [vmem:[%s1699_s0 + $0x108] ss:$16 sps:$4 sm:$0xff]  }
   0xd   :  { %v1207_v37 = vld [vmem:[%s1699_s0 + $0x124] ss:$16 sps:$4 sm:$0xff]   ;;  %v1209_v38 = vld [vmem:[%s1699_s0 + $0x12c] ss:$16 sps:$4 sm:$0xff]   ;;  %v1211_v39 = vld [vmem:[%s1699_s0 + $0x120] ss:$16 sps:$4 sm:$0xff]  }
   0xe   :  { %v1212_v40 = vld [vmem:[%s1699_s0 + $0x128] ss:$16 sps:$4 sm:$0xff]   ;;  %v1213_v41 = vld [vmem:[%s1699_s0 + $0x144] ss:$16 sps:$4 sm:$0xff]   ;;  %v1215_v42 = vld [vmem:[%s1699_s0 + $0x14c] ss:$16 sps:$4 sm:$0xff]  }
   0xf   :  { %678 = vmatpush1.bf16.msra.mxu0 %v1175_v15  ;;  %784 = vmatpush1.bf16.msra.mxu1 %v1176_v16  ;;  %v1217_v43 = vld [vmem:[%s1699_s0 + $0x140] ss:$16 sps:$4 sm:$0xff]   ;;  %v1218_v44 = vld [vmem:[%s1699_s0 + $0x148] ss:$16 sps:$4 sm:$0xff]   ;;  %v1219_v45 = vld [vmem:[%s1699_s0 + $0x164] ss:$16 sps:$4 sm:$0xff]  }
  0x10   :  { %679 = vmatprep.subr.bf16.mxu0 %v1177_v17  ;;  %785 = vmatprep.subr.bf16.mxu1 %v1179_v18  ;;  %v1221_v46 = vld [vmem:[%s1699_s0 + $0x16c] ss:$16 sps:$4 sm:$0xff]   ;;  %v1223_v47 = vld [vmem:[%s1699_s0 + $0x160] ss:$16 sps:$4 sm:$0xff]   ;;  %v1224_v48 = vld [vmem:[%s1699_s0 + $0x168] ss:$16 sps:$4 sm:$0xff]  }
  0x11   :  { %v1251_v49 = vld [vmem:[%s1700_s1 + $0x4] ss:$16 sps:$4 sm:$0xff]   ;;  %v1227_v51 = vld [vmem:[%s1699_s0 + $0x18c] ss:$16 sps:$4 sm:$0xff]   ;;  %v1229_v52 = vld [vmem:[%s1699_s0 + $0x180] ss:$16 sps:$4 sm:$0xff]  }
  0x12   :  { %v1225_v50 = vld [vmem:[%s1699_s0 + $0x184] ss:$16 sps:$4 sm:$0xff]   ;;  %703 = vmatprep.mubr.bf16.mxu0 %v1251_v49  ;;  %809 = vmatprep.mubr.bf16.mxu1 %v1251_v49  ;;  %v1230_v53 = vld [vmem:[%s1699_s0 + $0x188] ss:$16 sps:$4 sm:$0xff]   ;;  %v1233_v55 = vld [vmem:[%s1699_s0 + $0x1ac] ss:$16 sps:$4 sm:$0xff]  }
  0x13   :  { %680 = vmatpush1.bf16.msra.mxu0 %v1181_v19  ;;  %786 = vmatpush1.bf16.msra.mxu1 %v1182_v20  ;;  %v1231_v54 = vld [vmem:[%s1699_s0 + $0x1a4] ss:$16 sps:$4 sm:$0xff]   ;;  %v1235_v56 = vld [vmem:[%s1699_s0 + $0x1a0] ss:$16 sps:$4 sm:$0xff]   ;;  %v1236_v57 = vld [vmem:[%s1699_s0 + $0x1a8] ss:$16 sps:$4 sm:$0xff]  }
  0x14   :  { %681 = vmatprep.subr.bf16.mxu0 %v1183_v21  ;;  %787 = vmatprep.subr.bf16.mxu1 %v1185_v22  ;;  %v1237_v58 = vld [vmem:[%s1699_s0 + $0x1c4] ss:$16 sps:$4 sm:$0xff]   ;;  %v1239_v59 = vld [vmem:[%s1699_s0 + $0x1cc] ss:$16 sps:$4 sm:$0xff]   ;;  %v1241_v60 = vld [vmem:[%s1699_s0 + $0x1c0] ss:$16 sps:$4 sm:$0xff]  }
  0x15   :  { %v1242_v61 = vld [vmem:[%s1699_s0 + $0x1c8] ss:$16 sps:$4 sm:$0xff]   ;;  %v1243_v62 = vld [vmem:[%s1699_s0 + $0x1e4] ss:$16 sps:$4 sm:$0xff]   ;;  %v1245_v63 = vld [vmem:[%s1699_s0 + $0x1ec] ss:$16 sps:$4 sm:$0xff]  }
  0x16   :  { %v1247_v0 = vld [vmem:[%s1699_s0 + $0x1e0] ss:$16 sps:$4 sm:$0xff]   ;;  %v1248_v1 = vld [vmem:[%s1699_s0 + $0x1e8] ss:$16 sps:$4 sm:$0xff]   ;;  %v1254_v2 = vld [vmem:[%s1699_s0 + $0x204] ss:$16 sps:$4 sm:$0xff]  }
  0x17   :  { %682 = vmatpush1.bf16.msra.mxu0 %v1187_v23  ;;  %788 = vmatpush1.bf16.msra.mxu1 %v1188_v24  ;;  %v1257_v3 = vld [vmem:[%s1699_s0 + $0x20c] ss:$16 sps:$4 sm:$0xff]   ;;  %v1249_v4 = vld [vmem:[%s1700_s1] ss:$16 sps:$4 sm:$0xff]   ;;  %v1255_v6 = vld [vmem:[%s1699_s0 + $0x208] ss:$16 sps:$4 sm:$0xff]  }
  0x18   :  { %683 = vmatprep.subr.bf16.mxu0 %v1189_v25  ;;  %789 = vmatprep.subr.bf16.mxu1 %v1191_v26  ;;  %v1252_v5 = vld [vmem:[%s1699_s0 + $0x200] ss:$16 sps:$4 sm:$0xff]   ;;  %v1260_v7 = vld [vmem:[%s1699_s0 + $0x224] ss:$16 sps:$4 sm:$0xff]   ;;  %v1263_v8 = vld [vmem:[%s1699_s0 + $0x22c] ss:$16 sps:$4 sm:$0xff]  }
  0x19   :  { %v1294_v9 = vld [vmem:[%s1700_s1 + $0x24] ss:$16 sps:$4 sm:$0xff]   ;;  %v1258_v10 = vld [vmem:[%s1699_s0 + $0x220] ss:$16 sps:$4 sm:$0xff]   ;;  %v1261_v11 = vld [vmem:[%s1699_s0 + $0x228] ss:$16 sps:$4 sm:$0xff]  }
  0x1a   :  { %v1266_v12 = vld [vmem:[%s1699_s0 + $0x244] ss:$16 sps:$4 sm:$0xff]   ;;  %v1269_v13 = vld [vmem:[%s1699_s0 + $0x24c] ss:$16 sps:$4 sm:$0xff]   ;;  %v1264_v14 = vld [vmem:[%s1699_s0 + $0x240] ss:$16 sps:$4 sm:$0xff]  }
  0x1b   :  { %684 = vmatpush1.bf16.msra.mxu0 %v1193_v27  ;;  %790 = vmatpush1.bf16.msra.mxu1 %v1194_v28  ;;  %v1296_v15 = vld [vmem:[%s1700_s1 + $0x20] ss:$16 sps:$4 sm:$0xff]   ;;  %v1267_v16 = vld [vmem:[%s1699_s0 + $0x248] ss:$16 sps:$4 sm:$0xff]   ;;  %v1272_v19 = vld [vmem:[%s1699_s0 + $0x264] ss:$16 sps:$4 sm:$0xff]  }
  0x1c   :  { %685 = vmatprep.subr.bf16.mxu0 %v1195_v29  ;;  %791 = vmatprep.subr.bf16.mxu1 %v1197_v30  ;;  %v885_v17 = vld [vmem:[%s1701_s2 + $0x10] sm:$0xff]  ;;  %v883_v18 = vld [vmem:[%s1701_s2] sm:$0xff]  ;;  %v1275_v20 = vld [vmem:[%s1699_s0 + $0x26c] ss:$16 sps:$4 sm:$0xff]  }
  0x1d   :  { %v1311_v21 = vld [vmem:[%s1700_s1 + $0xc] ss:$16 sps:$4 sm:$0xff]   ;;  %899 = vperm.xlu1 %1152, %v885_v17   ;;  %889 = vperm.xlu0 %1151, %v883_v18   ;;  %v1270_v22 = vld [vmem:[%s1699_s0 + $0x260] ss:$16 sps:$4 sm:$0xff]   ;;  %v1273_v23 = vld [vmem:[%s1699_s0 + $0x268] ss:$16 sps:$4 sm:$0xff]  }
  0x1e   :  { %v886_v24 = vld [vmem:[%s1701_s2 + $0x18] sm:$0xff]  ;;  %v884_v25 = vld [vmem:[%s1701_s2 + $0x8] sm:$0xff]  ;;  %v1278_v26 = vld [vmem:[%s1699_s0 + $0x284] ss:$16 sps:$4 sm:$0xff]  }
  0x1f   :  { %686 = vmatpush1.bf16.msra.mxu0 %v1199_v31  ;;  %792 = vmatpush1.bf16.msra.mxu1 %v1200_v32  ;;  %v1281_v27 = vld [vmem:[%s1699_s0 + $0x28c] ss:$16 sps:$4 sm:$0xff]   ;;  %v1276_v28 = vld [vmem:[%s1699_s0 + $0x280] ss:$16 sps:$4 sm:$0xff]   ;;  %v1279_v29 = vld [vmem:[%s1699_s0 + $0x288] ss:$16 sps:$4 sm:$0xff]  }
  0x20   :  { %687 = vmatprep.subr.bf16.mxu0 %v1201_v33  ;;  %793 = vmatprep.subr.bf16.mxu1 %v1203_v34  ;;  %v908_v30 = vld [vmem:[%s1702_s3 + $0x8] sm:$0xff]  ;;  %v907_v31 = vld [vmem:[%s1702_s3] sm:$0xff] }
  0x21   :  { %904 = vperm.xlu1 %1152, %v886_v24   ;;  %894 = vperm.xlu0 %1151, %v884_v25   ;;  %v1284_v32 = vld [vmem:[%s1699_s0 + $0x2a4] ss:$16 sps:$4 sm:$0xff]   ;;  %v1287_v33 = vld [vmem:[%s1699_s0 + $0x2ac] ss:$16 sps:$4 sm:$0xff]   ;;  %v1282_v34 = vld [vmem:[%s1699_s0 + $0x2a0] ss:$16 sps:$4 sm:$0xff]  }
  0x22   :  { %v1306_v49 = vld [vmem:[%s1699_s0 + $0x308] ss:$16 sps:$4 sm:$0xff]  }
  0x23   :  { %688 = vmatpush1.bf16.msra.mxu0 %v1205_v35  ;;  %794 = vmatpush1.bf16.msra.mxu1 %v1206_v36  ;;  %v1285_v35 = vld [vmem:[%s1699_s0 + $0x2a8] ss:$16 sps:$4 sm:$0xff]  }
  0x24   :  { %689 = vmatprep.subr.bf16.mxu0 %v1207_v37  ;;  %795 = vmatprep.subr.bf16.mxu1 %v1209_v38  ;;  %v910_v36 = vld [vmem:[%s1702_s3 + $0x18] sm:$0xff]  ;;  %v909_v37 = vld [vmem:[%s1702_s3 + $0x10] sm:$0xff] }
  0x25   :  { %918 = vperm.xlu1 %1152, %v908_v30   ;;  %913 = vperm.xlu0 %1151, %v907_v31   ;;  %v1290_v38 = vld [vmem:[%s1699_s0 + $0x2c4] ss:$16 sps:$4 sm:$0xff]  }
  0x27   :  { %690 = vmatpush1.bf16.msra.mxu0 %v1211_v39  ;;  %796 = vmatpush1.bf16.msra.mxu1 %v1212_v40  ;;  %v1293_v39 = vld [vmem:[%s1699_s0 + $0x2cc] ss:$16 sps:$4 sm:$0xff]   ;;  %v1288_v40 = vld [vmem:[%s1699_s0 + $0x2c0] ss:$16 sps:$4 sm:$0xff]  }
  0x28   :  { %691 = vmatprep.subr.bf16.mxu0 %v1213_v41  ;;  %797 = vmatprep.subr.bf16.mxu1 %v1215_v42  ;;  %v1291_v41 = vld [vmem:[%s1699_s0 + $0x2c8] ss:$16 sps:$4 sm:$0xff]   ;;  %v1299_v42 = vld [vmem:[%s1699_s0 + $0x2e4] ss:$16 sps:$4 sm:$0xff]  }
  0x29   :  { %928 = vperm.xlu1 %1152, %v910_v36   ;;  %923 = vperm.xlu0 %1151, %v909_v37  }
  0x2b   :  { %692 = vmatpush1.bf16.msra.mxu0 %v1217_v43  ;;  %798 = vmatpush1.bf16.msra.mxu1 %v1218_v44  ;;  %v1302_v43 = vld [vmem:[%s1699_s0 + $0x2ec] ss:$16 sps:$4 sm:$0xff]   ;;  %v1297_v44 = vld [vmem:[%s1699_s0 + $0x2e0] ss:$16 sps:$4 sm:$0xff]  }
  0x2c   :  { %693 = vmatprep.subr.bf16.mxu0 %v1219_v45  ;;  %799 = vmatprep.subr.bf16.mxu1 %v1221_v46  ;;  %v1300_v45 = vld [vmem:[%s1699_s0 + $0x2e8] ss:$16 sps:$4 sm:$0xff]   ;;  %v1305_v46 = vld [vmem:[%s1699_s0 + $0x304] ss:$16 sps:$4 sm:$0xff]  }
  0x2f   :  { %694 = vmatpush1.bf16.msra.mxu0 %v1223_v47  ;;  %800 = vmatpush1.bf16.msra.mxu1 %v1224_v48  ;;  %v1308_v47 = vld [vmem:[%s1699_s0 + $0x30c] ss:$16 sps:$4 sm:$0xff]   ;;  %v1303_v48 = vld [vmem:[%s1699_s0 + $0x300] ss:$16 sps:$4 sm:$0xff]  }
  0x30   :  { %695 = vmatprep.subr.bf16.mxu0 %v1225_v50  ;;  %801 = vmatprep.subr.bf16.mxu1 %v1227_v51  ;;  %v1309_v50 = vld [vmem:[%s1700_s1 + $0x8] ss:$16 sps:$4 sm:$0xff]   ;;  %v1312_v51 = vld [vmem:[%s1700_s1 + $0x2c] ss:$16 sps:$4 sm:$0xff]  }
  0x33   :  { %696 = vmatpush1.bf16.msra.mxu0 %v1229_v52  ;;  %802 = vmatpush1.bf16.msra.mxu1 %v1230_v53  ;;  %v1314_v52 = vld [vmem:[%s1700_s1 + $0x28] ss:$16 sps:$4 sm:$0xff]  }
  0x34   :  { %697 = vmatprep.subr.bf16.mxu0 %v1231_v54  ;;  %803 = vmatprep.subr.bf16.mxu1 %v1233_v55 }
  0x37   :  { %698 = vmatpush1.bf16.msra.mxu0 %v1235_v56  ;;  %804 = vmatpush1.bf16.msra.mxu1 %v1236_v57 }
  0x38   :  { %699 = vmatprep.subr.bf16.mxu0 %v1237_v58  ;;  %805 = vmatprep.subr.bf16.mxu1 %v1239_v59 }
  0x3b   :  { %700 = vmatpush1.bf16.msra.mxu0 %v1241_v60  ;;  %806 = vmatpush1.bf16.msra.mxu1 %v1242_v61 }
  0x3c   :  { %701 = vmatprep.subr.bf16.mxu0 %v1243_v62  ;;  %807 = vmatprep.subr.bf16.mxu1 %v1245_v63 }
  0x3f   :  { %702 = vmatpush1.bf16.msra.mxu0 %v1247_v0  ;;  %808 = vmatpush1.bf16.msra.mxu1 %v1248_v1 }
  0x40   :  { %724 = vmatprep.subr.bf16.mxu0 %v1254_v2  ;;  %830 = vmatprep.subr.bf16.mxu1 %v1257_v3 }
  0x42   :  { %704 = vmatmul.mubr.bf16.vlgmr.msra.gmra.mrb[0].mxu0 %v1249_v4  ;;  %810 = vmatmul.mubr.bf16.vlgmr.msra.gmra.mrb[0].mxu1 %v1249_v4 }
  0x43   :  { %725 = vmatpush1.bf16.msra.mxu0 %v1252_v5  ;;  %831 = vmatpush1.bf16.msra.mxu1 %v1255_v6 }
  0x44   :  { %726 = vmatprep.subr.bf16.mxu0 %v1260_v7  ;;  %832 = vmatprep.subr.bf16.mxu1 %v1263_v8 }
  0x45   :  { %713 = vmatprep.mubr.bf16.mxu0 %v1294_v9  ;;  %819 = vmatprep.mubr.bf16.mxu1 %v1294_v9 }
  0x47   :  { %727 = vmatpush1.bf16.msra.mxu0 %v1258_v10  ;;  %833 = vmatpush1.bf16.msra.mxu1 %v1261_v11 }
  0x48   :  { %728 = vmatprep.subr.bf16.mxu0 %v1266_v12  ;;  %834 = vmatprep.subr.bf16.mxu1 %v1269_v13 }
  0x4a   :  { %714 = vmatmul.mubr.bf16.gmra.mrb[4].mxu0 %v1296_v15  ;;  %820 = vmatmul.mubr.bf16.gmra.mrb[4].mxu1 %v1296_v15 }
  0x4b   :  { %729 = vmatpush1.bf16.msra.mxu0 %v1264_v14  ;;  %835 = vmatpush1.bf16.msra.mxu1 %v1267_v16 }
  0x4c   :  { %730 = vmatprep.subr.bf16.mxu0 %v1272_v19  ;;  %836 = vmatprep.subr.bf16.mxu1 %v1275_v20 }
  0x4d   :  { %1111 = vmatprep.mubr.msk.bf16.mxu0 %vm664_vm0, %v1311_v21  ;;  %1113 = vmatprep.mubr.msk.bf16.mxu1 %vm664_vm0, %v1311_v21 }
  0x4f   :  { %731 = vmatpush1.bf16.msra.mxu0 %v1270_v22  ;;  %837 = vmatpush1.bf16.msra.mxu1 %v1273_v23 }
  0x50   :  { %732 = vmatprep.subr.bf16.mxu0 %v1278_v26  ;;  %838 = vmatprep.subr.bf16.mxu1 %v1281_v27 }
  0x53   :  { %733 = vmatpush1.bf16.msra.mxu0 %v1276_v28  ;;  %839 = vmatpush1.bf16.msra.mxu1 %v1279_v29 }
  0x54   :  { %734 = vmatprep.subr.bf16.mxu0 %v1284_v32  ;;  %840 = vmatprep.subr.bf16.mxu1 %v1287_v33 }
  0x57   :  { %735 = vmatpush1.bf16.msra.mxu0 %v1282_v34  ;;  %841 = vmatpush1.bf16.msra.mxu1 %v1285_v35 }
  0x58   :  { %736 = vmatprep.subr.bf16.mxu0 %v1290_v38  ;;  %842 = vmatprep.subr.bf16.mxu1 %v1293_v39 }
  0x5b   :  { %737 = vmatpush1.bf16.msra.mxu0 %v1288_v40  ;;  %843 = vmatpush1.bf16.msra.mxu1 %v1291_v41 }
  0x5c   :  { %738 = vmatprep.subr.bf16.mxu0 %v1299_v42  ;;  %844 = vmatprep.subr.bf16.mxu1 %v1302_v43 }
  0x5f   :  { %739 = vmatpush1.bf16.msra.mxu0 %v1297_v44  ;;  %845 = vmatpush1.bf16.msra.mxu1 %v1300_v45 }
  0x60   :  { %740 = vmatprep.subr.bf16.mxu0 %v1305_v46  ;;  %846 = vmatprep.subr.bf16.mxu1 %v1308_v47 }
  0x63   :  { %741 = vmatpush1.bf16.msra.mxu0 %v1303_v48  ;;  %847 = vmatpush1.bf16.msra.mxu1 %v1306_v49 }
  0x66   :  { %757 = vmatmul.mubr.bf16.vlgmr.msra.gmra.mrb[0].mxu0 %v1309_v50  ;;  %863 = vmatmul.mubr.bf16.vlgmr.msra.gmra.mrb[0].mxu1 %v1309_v50 }
  0x67   :  { %1112 = vmatprep.mubr.msk.bf16.mxu0 %vm664_vm0, %v1312_v51  ;;  %1114 = vmatprep.mubr.msk.bf16.mxu1 %vm664_vm0, %v1312_v51 }
  0x6e   :  { %767 = vmatmul.mubr.bf16.gmra.mrb[4].mxu0 %v1314_v52  ;;  %873 = vmatmul.mubr.bf16.gmra.mrb[4].mxu1 %v1314_v52 }
  0x9c   :  { %v890_v53 = vpop.permute.xlu0 %889  ;;  %v900_v54 = vpop.permute.xlu1 %899 }
  0xa0   :  { %v895_v55 = vpop.permute.xlu0 %894  ;;  %v905_v56 = vpop.permute.xlu1 %904 }
  0xa4   :  { %v914_v57 = vpop.permute.xlu0 %913  ;;  %v919_v10 = vpop.permute.xlu1 %918 }
  0xa8   :  { %v924_v21 = vpop.permute.xlu0 %923  ;;  %v929_v43 = vpop.permute.xlu1 %928 }
 0x139   :  { %v758_v58 = vpop.f32.mrb[0].mxu0  ;;  %v864_v59 = vpop.f32.mrb[0].mxu1 }
 0x13a   :  { %v931_v60 = vmul.f32 %v890_v53, %v758_v58  ;;  %v951_v61 = vmul.f32 %v890_v53, %v864_v59  ;;  %v760_v62 = vpop.f32.mrb[1].mxu0  ;;  %v866_v63 = vpop.f32.mrb[1].mxu1 }
 0x13b   :  { %v939_v0 = vmul.f32 %v890_v53, %v760_v62  ;;  %v959_v1 = vmul.f32 %v890_v53, %v866_v63  ;;  %v762_v2 = vpop.f32.mrb[2].mxu0  ;;  %v868_v3 = vpop.f32.mrb[2].mxu1 }
 0x13c   :  { %v935_v4 = vadd.f32 %v931_v60, %v914_v57  ;;  %v955_v5 = vadd.f32 %v951_v61, %v914_v57  ;;  %v932_v6 = vmul.f32 %v895_v55, %v762_v2  ;;  %v952_v7 = vmul.f32 %v895_v55, %v868_v3  ;;  %v764_v8 = vpop.f32.mrb[3].mxu0  ;;  %v870_v9 = vpop.f32.mrb[3].mxu1 }
 0x13d   :  { %v943_v11 = vadd.f32 %v939_v0, %v914_v57  ;;  %v963_v12 = vadd.f32 %v959_v1, %v914_v57  ;;  %v940_v13 = vmul.f32 %v895_v55, %v764_v8  ;;  %v960_v14 = vmul.f32 %v895_v55, %v870_v9 }
 0x13e   :  { %v936_v15 = vadd.f32 %v932_v6, %v919_v10  ;;  %v956_v16 = vadd.f32 %v952_v7, %v919_v10 }
 0x13f   :  { %v947_v17 = vmax.f32 %v935_v4, %v943_v11  ;;  %v967_v18 = vmax.f32 %v955_v5, %v963_v12  ;;  %v944_v19 = vadd.f32 %v940_v13, %v919_v10  ;;  %v964_v20 = vadd.f32 %v960_v14, %v919_v10 }
 0x141   :  { %v971_v22 = vmax.f32 %v947_v17, %v967_v18  ;;  %v948_v23 = vmax.f32 %v936_v15, %v944_v19  ;;  %v968_v24 = vmax.f32 %v956_v16, %v964_v20  ;;  %v768_v25 = vpop.f32.mrb[4].mxu0  ;;  %v874_v26 = vpop.f32.mrb[4].mxu1 }
 0x142   :  { %v933_v27 = vmul.f32 %v900_v54, %v768_v25  ;;  %v953_v28 = vmul.f32 %v900_v54, %v874_v26  ;;  %v770_v29 = vpop.f32.mrb[5].mxu0  ;;  %v876_v30 = vpop.f32.mrb[5].mxu1 }
 0x143   :  { %v975_v31 = vmax.f32 %v971_v22, 0.0  ;;  %v972_v32 = vmax.f32 %v948_v23, %v968_v24  ;;  %v941_v33 = vmul.f32 %v900_v54, %v770_v29  ;;  %v961_v34 = vmul.f32 %v900_v54, %v876_v30  ;;  %v772_v35 = vpop.f32.mrb[6].mxu0  ;;  %v878_v36 = vpop.f32.mrb[6].mxu1 }
 0x144   :  { %v937_v37 = vadd.f32 %v933_v27, %v924_v21  ;;  %v957_v38 = vadd.f32 %v953_v28, %v924_v21  ;;  %v934_v39 = vmul.f32 %v905_v56, %v772_v35  ;;  %v954_v40 = vmul.f32 %v905_v56, %v878_v36  ;;  %v774_v41 = vpop.f32.mrb[7].mxu0  ;;  %v880_v42 = vpop.f32.mrb[7].mxu1 }
 0x145   :  { %v976_v44 = vmax.f32 %v972_v32, 0.0  ;;  %v945_v45 = vadd.f32 %v941_v33, %v924_v21  ;;  %v965_v46 = vadd.f32 %v961_v34, %v924_v21  ;;  %v942_v47 = vmul.f32 %v905_v56, %v774_v41 }
 0x146   :  { %v938_v48 = vadd.f32 %v934_v39, %v929_v43  ;;  %v958_v49 = vadd.f32 %v954_v40, %v929_v43  ;;  %v962_v50 = vmul.f32 %v905_v56, %v880_v42 }
 0x147   :  { %v1126_v51 = vpack.c.bf16 %v976_v44, %v975_v31  ;;  %v949_v52 = vmax.f32 %v937_v37, %v945_v45  ;;  %v969_v53 = vmax.f32 %v957_v38, %v965_v46  ;;  %v946_v54 = vadd.f32 %v942_v47, %v929_v43 }
 0x148   :  { %v966_v55 = vadd.f32 %v962_v50, %v929_v43 }
 0x149   :  { %1127 = vst [vmem:[%s1703_s4] sm:$0xff] %v1126_v51   ;;  %v973_v57 = vmax.f32 %v949_v52, %v969_v53  ;;  %v950_v58 = vmax.f32 %v938_v48, %v946_v54 }
 0x14a   :  { %v970_v59 = vmax.f32 %v958_v49, %v966_v55 }
 0x14b   :  { %v977_v61 = vmax.f32 %v973_v57, 0.0 }
 0x14c   :  { %v974_v60 = vmax.f32 %v950_v58, %v970_v59 }
 0x14e   :  { %v978_v62 = vmax.f32 %v974_v60, 0.0 }
 0x150   :  { %v1131_v63 = vpack.c.bf16 %v978_v62, %v977_v61 }
 0x152   :  { %1133 = vst [vmem:[%s1703_s4 + $0x8] sm:$0xff] %v1131_v63  }

// kernel: forward.5
= control target key start
LH: loop header
LB: loop body
LE: loop exit
PB: predicated region body
PF: predicated region fallthrough
CT: control target
= control target key end

     0   :  { %v293_v28 = vlaneseq  ;;  %v2046_v36 = vmov 1966171168   ;;  %s2515_s0 = inlined_call_operand.vmem [shape: bf16[2,2048], index: 0, kind: input, shape index: {}]   ;;  %s2516_s1 = inlined_call_operand.vmem [shape: bf16[2048,10], index: 1, kind: input, shape index: {}]   ;;  %s2517_s2 = inlined_call_operand.vmem [shape: f32[1,10], index: 2, kind: input, shape index: {}]   ;;  %s2518_s3 = inlined_call_operand.vmem [shape: bf16[10,10], index: 3, kind: input, shape index: {}]   ;;  %s2519_s4 = inlined_call_operand.vmem [shape: f32[1,10], index: 4, kind: input, shape index: {}]   ;;  %s2520_s5 = inlined_call_operand.hbm [shape: f32[2,10], index: 5, kind: output, shape index: {}]  }
   0x1   :  { %v1891_v0 = vld [vmem:[%s2516_s1 + $0x40] sm:$0xff]   ;;  %v1895_v4 = vld [vmem:[%s2516_s1 + $0x48] sm:$0xff]   ;;  %v1899_v8 = vld [vmem:[%s2516_s1 + $0x50] sm:$0xff]   ;;  %v291_v37 = vunpack.c.l.s4 %v2046_v36 }
   0x2   :  { %v1892_v1 = vld [vmem:[%s2516_s1 + $0xc0] sm:$0xff]   ;;  %1703 = vmatprep.subr.bf16.mxu0 %v1891_v0  ;;  %v1896_v5 = vld [vmem:[%s2516_s1 + $0xc8] sm:$0xff]   ;;  %v1900_v9 = vld [vmem:[%s2516_s1 + $0xd0] sm:$0xff]   ;;  %v294_v33 = vshrl.u32 %v293_v28, 7 }
   0x3   :  { %v1893_v2 = vld [vmem:[%s2516_s1] sm:$0xff]   ;;  %1725 = vmatprep.subr.bf16.mxu1 %v1892_v1  ;;  %v1897_v6 = vld [vmem:[%s2516_s1 + $0x8] sm:$0xff]   ;;  %v1901_v10 = vld [vmem:[%s2516_s1 + $0x10] sm:$0xff]   ;;  %v292_v40 = vunpack.c.0.s8 %v291_v37 }
   0x4   :  { %v1894_v3 = vld [vmem:[%s2516_s1 + $0x80] sm:$0xff]   ;;  %1704 = vmatpush3.bf16.msra.mxu0 %v1893_v2  ;;  %v1898_v7 = vld [vmem:[%s2516_s1 + $0x88] sm:$0xff]   ;;  %v1902_v11 = vld [vmem:[%s2516_s1 + $0x90] sm:$0xff]  }
   0x5   :  { %1726 = vmatpush3.bf16.msra.mxu1 %v1894_v3  ;;  %1705 = vmatprep.subr.bf16.mxu0 %v1895_v4  ;;  %v1903_v12 = vld [vmem:[%s2516_s1 + $0x58] sm:$0xff]   ;;  %v1907_v16 = vld [vmem:[%s2516_s1 + $0x60] sm:$0xff]   ;;  %v1911_v20 = vld [vmem:[%s2516_s1 + $0x68] sm:$0xff]   ;;  %v2185_v41 = vsub.s32 %v292_v40, %v294_v33 }
   0x6   :  { %1727 = vmatprep.subr.bf16.mxu1 %v1896_v5  ;;  %v1904_v13 = vld [vmem:[%s2516_s1 + $0xd8] sm:$0xff]   ;;  %v1908_v17 = vld [vmem:[%s2516_s1 + $0xe0] sm:$0xff]   ;;  %v1912_v21 = vld [vmem:[%s2516_s1 + $0xe8] sm:$0xff]  }
   0x7   :  { %v1905_v14 = vld [vmem:[%s2516_s1 + $0x18] sm:$0xff]   ;;  %v1909_v18 = vld [vmem:[%s2516_s1 + $0x20] sm:$0xff]   ;;  %v1913_v22 = vld [vmem:[%s2516_s1 + $0x28] sm:$0xff]  }
   0x8   :  { %1706 = vmatpush3.bf16.msra.mxu0 %v1897_v6  ;;  %v1906_v15 = vld [vmem:[%s2516_s1 + $0x98] sm:$0xff]   ;;  %v1910_v19 = vld [vmem:[%s2516_s1 + $0xa0] sm:$0xff]   ;;  %v1914_v23 = vld [vmem:[%s2516_s1 + $0xa8] sm:$0xff]  }
   0x9   :  { %1728 = vmatpush3.bf16.msra.mxu1 %v1898_v7  ;;  %1707 = vmatprep.subr.bf16.mxu0 %v1899_v8  ;;  %v1915_v24 = vld [vmem:[%s2516_s1 + $0x70] sm:$0xff]   ;;  %v1919_v29 = vld [vmem:[%s2516_s1 + $0x78] sm:$0xff]   ;;  %v22_v34 = vld [vmem:[%s2515_s0] sm:$0xff] }
   0xa   :  { %1729 = vmatprep.subr.bf16.mxu1 %v1900_v9  ;;  %v1916_v25 = vld [vmem:[%s2516_s1 + $0xf0] sm:$0xff]   ;;  %v1920_v30 = vld [vmem:[%s2516_s1 + $0xf8] sm:$0xff]   ;;  %v1924_v35 = vld [vmem:[%s2516_s1 + $0x140] sm:$0xff]   ;;  %v289_v39 = vcombine.high %v22_v34, %v22_v34  ;;  %v296_v42 = vrot.slane %v22_v34, %v2185_v41 }
   0xb   :  { %v1917_v26 = vld [vmem:[%s2516_s1 + $0x30] sm:$0xff]   ;;  %v1921_v31 = vld [vmem:[%s2516_s1 + $0x38] sm:$0xff]   ;;  %v1925_v38 = vld [vmem:[%s2516_s1 + $0x1c0] sm:$0xff]  }
   0xc   :  { %1708 = vmatpush3.bf16.msra.mxu0 %v1901_v10  ;;  %v1918_v27 = vld [vmem:[%s2516_s1 + $0xb0] sm:$0xff]   ;;  %v1922_v32 = vld [vmem:[%s2516_s1 + $0xb8] sm:$0xff]   ;;  %v2189_v43 = vrot.slane %v289_v39, %v2185_v41  ;;  %v304_v44 = vcombine.high %v296_v42, %v296_v42  ;;  %v312_v45 = vrot.slane %v296_v42, %v2185_v41  ;;  %v1926_v48 = vld [vmem:[%s2516_s1 + $0x100] sm:$0xff]  }
   0xd   :  { %1730 = vmatpush3.bf16.msra.mxu1 %v1902_v11  ;;  %1709 = vmatprep.subr.bf16.mxu0 %v1903_v12  ;;  %v1928_v51 = vld [vmem:[%s2516_s1 + $0x148] sm:$0xff]   ;;  %v1927_v53 = vld [vmem:[%s2516_s1 + $0x180] sm:$0xff]   ;;  %v1932_v57 = vld [vmem:[%s2516_s1 + $0x150] sm:$0xff]  }
   0xe   :  { %1731 = vmatprep.subr.bf16.mxu1 %v1904_v13  ;;  %v305_v46 = vcombine.high %v2189_v43, %v2189_v43  ;;  %v326_v47 = vrot.slane %v304_v44, %v2185_v41  ;;  %v334_v50 = vcombine.high %v312_v45, %v312_v45  ;;  %v1929_v54 = vld [vmem:[%s2516_s1 + $0x1c8] sm:$0xff]   ;;  %v1933_v59 = vld [vmem:[%s2516_s1 + $0x1d0] sm:$0xff]   ;;  %v1936_v61 = vld [vmem:[%s2516_s1 + $0x158] sm:$0xff]  }
   0xf   :  { %v1930_v56 = vld [vmem:[%s2516_s1 + $0x108] sm:$0xff]   ;;  %v1934_v60 = vld [vmem:[%s2516_s1 + $0x110] sm:$0xff]   ;;  %v1937_v63 = vld [vmem:[%s2516_s1 + $0x1d8] sm:$0xff]  }
  0x10   :  { %1710 = vmatpush3.bf16.msra.mxu0 %v1905_v14  ;;  %v333_v49 = vrot.slane %v305_v46, %v2185_v41  ;;  %1203 = vmatprep.mubr.bf16.mxu0 %v326_v47  ;;  %v336_v52 = vcombine.high %v326_v47, %v326_v47  ;;  %v1931_v58 = vld [vmem:[%s2516_s1 + $0x188] sm:$0xff]   ;;  %v1935_v62 = vld [vmem:[%s2516_s1 + $0x190] sm:$0xff]   ;;  %v1938_v0 = vld [vmem:[%s2516_s1 + $0x118] sm:$0xff]  }
  0x11   :  { %1732 = vmatpush3.bf16.msra.mxu1 %v1906_v15  ;;  %1711 = vmatprep.subr.bf16.mxu0 %v1907_v16  ;;  %v1940_v1 = vld [vmem:[%s2516_s1 + $0x160] sm:$0xff]   ;;  %v1939_v2 = vld [vmem:[%s2516_s1 + $0x198] sm:$0xff]   ;;  %v1944_v5 = vld [vmem:[%s2516_s1 + $0x168] sm:$0xff]  }
  0x12   :  { %1733 = vmatprep.subr.bf16.mxu1 %v1908_v17  ;;  %v337_v55 = vcombine.high %v333_v49, %v333_v49  ;;  %1243 = vmatprep.mubr.bf16.mxu1 %v336_v52  ;;  %v1941_v3 = vld [vmem:[%s2516_s1 + $0x1e0] sm:$0xff]   ;;  %v1945_v7 = vld [vmem:[%s2516_s1 + $0x1e8] sm:$0xff]   ;;  %v1948_v9 = vld [vmem:[%s2516_s1 + $0x170] sm:$0xff]   ;;  %v319_v17 = vrot.slane %v2189_v43, %v2185_v41 }
  0x13   :  { %v1942_v4 = vld [vmem:[%s2516_s1 + $0x120] sm:$0xff]   ;;  %v1946_v8 = vld [vmem:[%s2516_s1 + $0x128] sm:$0xff]   ;;  %v1949_v11 = vld [vmem:[%s2516_s1 + $0x1f0] sm:$0xff]  }
  0x14   :  { %1712 = vmatpush3.bf16.msra.mxu0 %v1909_v18  ;;  %v1943_v6 = vld [vmem:[%s2516_s1 + $0x1a0] sm:$0xff]   ;;  %v1947_v10 = vld [vmem:[%s2516_s1 + $0x1a8] sm:$0xff]   ;;  %v1950_v12 = vld [vmem:[%s2516_s1 + $0x130] sm:$0xff]  }
  0x15   :  { %1734 = vmatpush3.bf16.msra.mxu1 %v1910_v19  ;;  %1713 = vmatprep.subr.bf16.mxu0 %v1911_v20  ;;  %v1952_v13 = vld [vmem:[%s2516_s1 + $0x178] sm:$0xff]   ;;  %v1951_v14 = vld [vmem:[%s2516_s1 + $0x1b0] sm:$0xff]   ;;  %v1956_v18 = vld [vmem:[%s2516_s1 + $0x240] sm:$0xff]  }
  0x16   :  { %1735 = vmatprep.subr.bf16.mxu1 %v1912_v21  ;;  %v1953_v15 = vld [vmem:[%s2516_s1 + $0x1f8] sm:$0xff]   ;;  %v1957_v20 = vld [vmem:[%s2516_s1 + $0x2c0] sm:$0xff]   ;;  %v1963_v28 = vld [vmem:[%s2516_s1 + $0x288] sm:$0xff]  }
  0x17   :  { %v1954_v16 = vld [vmem:[%s2516_s1 + $0x138] sm:$0xff]   ;;  %v1958_v21 = vld [vmem:[%s2516_s1 + $0x200] sm:$0xff]   ;;  %v1976_v39 = vld [vmem:[%s2516_s1 + $0x268] sm:$0xff]  }
  0x18   :  { %1714 = vmatpush3.bf16.msra.mxu0 %v1913_v22  ;;  %v1955_v19 = vld [vmem:[%s2516_s1 + $0x1b8] sm:$0xff]   ;;  %v335_v22 = vcombine.high %v319_v17, %v319_v17  ;;  %v1973_v37 = vld [vmem:[%s2516_s1 + $0x2e0] sm:$0xff]   ;;  %v1977_v42 = vld [vmem:[%s2516_s1 + $0x2e8] sm:$0xff]  }
  0x19   :  { %1736 = vmatpush3.bf16.msra.mxu1 %v1914_v23  ;;  %1715 = vmatprep.subr.bf16.mxu0 %v1915_v24  ;;  %v1960_v23 = vld [vmem:[%s2516_s1 + $0x248] sm:$0xff]   ;;  %v1959_v24 = vld [vmem:[%s2516_s1 + $0x280] sm:$0xff]   ;;  %v1969_v33 = vld [vmem:[%s2516_s1 + $0x2d8] sm:$0xff]  }
  0x1a   :  { %1737 = vmatprep.subr.bf16.mxu1 %v1916_v25  ;;  %v1961_v25 = vld [vmem:[%s2516_s1 + $0x2c8] sm:$0xff]   ;;  %v1970_v34 = vld [vmem:[%s2516_s1 + $0x218] sm:$0xff]   ;;  %v1975_v40 = vld [vmem:[%s2516_s1 + $0x2a0] sm:$0xff]  }
  0x1b   :  { %v1971_v36 = vld [vmem:[%s2516_s1 + $0x298] sm:$0xff]   ;;  %v1978_v43 = vld [vmem:[%s2516_s1 + $0x228] sm:$0xff]   ;;  %v1980_v44 = vld [vmem:[%s2516_s1 + $0x270] sm:$0xff]  }
  0x1c   :  { %1716 = vmatpush3.bf16.msra.mxu0 %v1917_v26  ;;  %v1962_v26 = vld [vmem:[%s2516_s1 + $0x208] sm:$0xff]  }
  0x1d   :  { %1738 = vmatpush3.bf16.msra.mxu1 %v1918_v27  ;;  %1717 = vmatprep.subr.bf16.mxu0 %v1919_v29  ;;  %v1964_v27 = vld [vmem:[%s2516_s1 + $0x250] sm:$0xff]   ;;  %v1979_v46 = vld [vmem:[%s2516_s1 + $0x2a8] sm:$0xff]  }
  0x1e   :  { %1739 = vmatprep.subr.bf16.mxu1 %v1920_v30  ;;  %v1965_v29 = vld [vmem:[%s2516_s1 + $0x2d0] sm:$0xff]  }
  0x1f   :  { %v1966_v30 = vld [vmem:[%s2516_s1 + $0x210] sm:$0xff]  }
  0x20   :  { %1718 = vmatpush3.bf16.msra.mxu0 %v1921_v31  ;;  %v1968_v31 = vld [vmem:[%s2516_s1 + $0x258] sm:$0xff]  }
  0x21   :  { %1740 = vmatpush3.bf16.msra.mxu1 %v1922_v32  ;;  %1747 = vmatprep.subr.bf16.mxu0 %v1924_v35  ;;  %v1967_v32 = vld [vmem:[%s2516_s1 + $0x290] sm:$0xff]   ;;  %v1972_v35 = vld [vmem:[%s2516_s1 + $0x260] sm:$0xff]  }
  0x22   :  { %1769 = vmatprep.subr.bf16.mxu1 %v1925_v38  ;;  %v1974_v38 = vld [vmem:[%s2516_s1 + $0x220] sm:$0xff]  }
  0x23   :  { %1204 = vmatmul.mubr.bf16.vlgmr.msra.gmra.mrb[0].mxu0 %v312_v45  ;;  %v23_v45 = vld [vmem:[%s2515_s0 + $0x8] sm:$0xff] }
  0x24   :  { %1748 = vmatpush3.bf16.msra.mxu0 %v1926_v48  ;;  %1244 = vmatmul.mubr.bf16.vlgmr.msra.gmra.mrb[0].mxu1 %v334_v50  ;;  %v345_v47 = vrot.slane %v23_v45, %v2185_v41  ;;  %v338_v48 = vcombine.high %v23_v45, %v23_v45  ;;  %v1982_v50 = vld [vmem:[%s2516_s1 + $0x230] sm:$0xff]  }
  0x25   :  { %1749 = vmatprep.subr.bf16.mxu0 %v1928_v51  ;;  %1770 = vmatpush3.bf16.msra.mxu1 %v1927_v53  ;;  %v1984_v53 = vld [vmem:[%s2516_s1 + $0x278] sm:$0xff]  }
  0x26   :  { %1283 = vmatprep.mubr.bf16.mxu0 %v333_v49  ;;  %1771 = vmatprep.subr.bf16.mxu1 %v1929_v54  ;;  %v1981_v49 = vld [vmem:[%s2516_s1 + $0x2f0] sm:$0xff]   ;;  %v353_v51 = vcombine.high %v345_v47, %v345_v47  ;;  %v2374_v52 = vrot.slane %v338_v48, %v2185_v41 }
  0x27   :  { %1323 = vmatprep.mubr.bf16.mxu1 %v337_v55  ;;  %v1983_v54 = vld [vmem:[%s2516_s1 + $0x2b0] sm:$0xff]  }
  0x28   :  { %1750 = vmatpush3.bf16.msra.mxu0 %v1930_v56  ;;  %v375_v55 = vrot.slane %v353_v51, %v2185_v41  ;;  %v354_v56 = vcombine.high %v2374_v52, %v2374_v52 }
  0x29   :  { %1751 = vmatprep.subr.bf16.mxu0 %v1932_v57  ;;  %1772 = vmatpush3.bf16.msra.mxu1 %v1931_v58  ;;  %v1985_v57 = vld [vmem:[%s2516_s1 + $0x2f8] sm:$0xff]  }
  0x2a   :  { %1773 = vmatprep.subr.bf16.mxu1 %v1933_v59  ;;  %v1986_v58 = vld [vmem:[%s2516_s1 + $0x238] sm:$0xff]   ;;  %v385_v59 = vcombine.high %v375_v55, %v375_v55 }
  0x2c   :  { %1752 = vmatpush3.bf16.msra.mxu0 %v1934_v60  ;;  %v361_v60 = vrot.slane %v345_v47, %v2185_v41 }
  0x2d   :  { %1753 = vmatprep.subr.bf16.mxu0 %v1936_v61  ;;  %1774 = vmatpush3.bf16.msra.mxu1 %v1935_v62  ;;  %v1988_v61 = vld [vmem:[%s2516_s1 + $0x340] sm:$0xff]   ;;  %v1987_v62 = vld [vmem:[%s2516_s1 + $0x2b8] sm:$0xff]  }
  0x2e   :  { %1775 = vmatprep.subr.bf16.mxu1 %v1937_v63  ;;  %v382_v63 = vrot.slane %v354_v56, %v2185_v41 }
  0x30   :  { %1754 = vmatpush3.bf16.msra.mxu0 %v1938_v0  ;;  %v1989_v0 = vld [vmem:[%s2516_s1 + $0x3c0] sm:$0xff]  }
  0x31   :  { %1755 = vmatprep.subr.bf16.mxu0 %v1940_v1  ;;  %1776 = vmatpush3.bf16.msra.mxu1 %v1939_v2  ;;  %v1990_v1 = vld [vmem:[%s2516_s1 + $0x300] sm:$0xff]   ;;  %v383_v2 = vcombine.high %v361_v60, %v361_v60 }
  0x32   :  { %1777 = vmatprep.subr.bf16.mxu1 %v1941_v3  ;;  %v1992_v3 = vld [vmem:[%s2516_s1 + $0x348] sm:$0xff]  }
  0x34   :  { %1756 = vmatpush3.bf16.msra.mxu0 %v1942_v4  ;;  %v1991_v4 = vld [vmem:[%s2516_s1 + $0x380] sm:$0xff]  }
  0x35   :  { %1757 = vmatprep.subr.bf16.mxu0 %v1944_v5  ;;  %1778 = vmatpush3.bf16.msra.mxu1 %v1943_v6  ;;  %v386_v5 = vcombine.high %v382_v63, %v382_v63  ;;  %v1993_v6 = vld [vmem:[%s2516_s1 + $0x3c8] sm:$0xff]  }
  0x36   :  { %1779 = vmatprep.subr.bf16.mxu1 %v1945_v7  ;;  %v1994_v7 = vld [vmem:[%s2516_s1 + $0x308] sm:$0xff]  }
  0x38   :  { %1758 = vmatpush3.bf16.msra.mxu0 %v1946_v8  ;;  %v1996_v8 = vld [vmem:[%s2516_s1 + $0x350] sm:$0xff]  }
  0x39   :  { %1759 = vmatprep.subr.bf16.mxu0 %v1948_v9  ;;  %1780 = vmatpush3.bf16.msra.mxu1 %v1947_v10  ;;  %v1995_v9 = vld [vmem:[%s2516_s1 + $0x388] sm:$0xff]   ;;  %v1997_v10 = vld [vmem:[%s2516_s1 + $0x3d0] sm:$0xff]  }
  0x3a   :  { %1781 = vmatprep.subr.bf16.mxu1 %v1949_v11  ;;  %v1998_v11 = vld [vmem:[%s2516_s1 + $0x310] sm:$0xff]  }
  0x3c   :  { %1760 = vmatpush3.bf16.msra.mxu0 %v1950_v12  ;;  %v2000_v12 = vld [vmem:[%s2516_s1 + $0x358] sm:$0xff]  }
  0x3d   :  { %1761 = vmatprep.subr.bf16.mxu0 %v1952_v13  ;;  %1782 = vmatpush3.bf16.msra.mxu1 %v1951_v14  ;;  %v1999_v13 = vld [vmem:[%s2516_s1 + $0x390] sm:$0xff]   ;;  %v2001_v14 = vld [vmem:[%s2516_s1 + $0x3d8] sm:$0xff]  }
  0x3e   :  { %1783 = vmatprep.subr.bf16.mxu1 %v1953_v15  ;;  %v2002_v15 = vld [vmem:[%s2516_s1 + $0x318] sm:$0xff]  }
  0x40   :  { %1762 = vmatpush3.bf16.msra.mxu0 %v1954_v16  ;;  %v2004_v16 = vld [vmem:[%s2516_s1 + $0x360] sm:$0xff]  }
  0x41   :  { %1791 = vmatprep.subr.bf16.mxu0 %v1956_v18  ;;  %1784 = vmatpush3.bf16.msra.mxu1 %v1955_v19  ;;  %v2005_v18 = vld [vmem:[%s2516_s1 + $0x3e0] sm:$0xff]  }
  0x42   :  { %1813 = vmatprep.subr.bf16.mxu1 %v1957_v20  ;;  %v2006_v19 = vld [vmem:[%s2516_s1 + $0x320] sm:$0xff]   ;;  %v2008_v20 = vld [vmem:[%s2516_s1 + $0x368] sm:$0xff]  }
  0x43   :  { %1284 = vmatmul.mubr.bf16.vlgmr.msra.gmra.mrb[4].mxu0 %v319_v17  ;;  %v2003_v17 = vld [vmem:[%s2516_s1 + $0x398] sm:$0xff]  }
  0x44   :  { %1792 = vmatpush3.bf16.msra.mxu0 %v1958_v21  ;;  %1324 = vmatmul.mubr.bf16.vlgmr.msra.gmra.mrb[4].mxu1 %v335_v22  ;;  %v2007_v21 = vld [vmem:[%s2516_s1 + $0x3a0] sm:$0xff]   ;;  %v2009_v22 = vld [vmem:[%s2516_s1 + $0x3e8] sm:$0xff]  }
  0x45   :  { %1793 = vmatprep.subr.bf16.mxu0 %v1960_v23  ;;  %1814 = vmatpush3.bf16.msra.mxu1 %v1959_v24  ;;  %v2010_v23 = vld [vmem:[%s2516_s1 + $0x328] sm:$0xff]   ;;  %v2012_v24 = vld [vmem:[%s2516_s1 + $0x370] sm:$0xff]  }
  0x46   :  { %1815 = vmatprep.subr.bf16.mxu1 %v1961_v25  ;;  %1363 = vmatprep.mubr.bf16.mxu0 %v375_v55  ;;  %v2011_v25 = vld [vmem:[%s2516_s1 + $0x3a8] sm:$0xff]  }
  0x47   :  { %1403 = vmatprep.mubr.bf16.mxu1 %v385_v59 }
  0x48   :  { %1794 = vmatpush3.bf16.msra.mxu0 %v1962_v26 }
  0x49   :  { %1795 = vmatprep.subr.bf16.mxu0 %v1964_v27  ;;  %1816 = vmatpush3.bf16.msra.mxu1 %v1963_v28 }
  0x4a   :  { %1817 = vmatprep.subr.bf16.mxu1 %v1965_v29 }
  0x4c   :  { %1796 = vmatpush3.bf16.msra.mxu0 %v1966_v30 }
  0x4d   :  { %1797 = vmatprep.subr.bf16.mxu0 %v1968_v31  ;;  %1818 = vmatpush3.bf16.msra.mxu1 %v1967_v32 }
  0x4e   :  { %1819 = vmatprep.subr.bf16.mxu1 %v1969_v33 }
  0x50   :  { %1798 = vmatpush3.bf16.msra.mxu0 %v1970_v34 }
  0x51   :  { %1799 = vmatprep.subr.bf16.mxu0 %v1972_v35  ;;  %1820 = vmatpush3.bf16.msra.mxu1 %v1971_v36 }
  0x52   :  { %1821 = vmatprep.subr.bf16.mxu1 %v1973_v37 }
  0x54   :  { %1800 = vmatpush3.bf16.msra.mxu0 %v1974_v38 }
  0x55   :  { %1801 = vmatprep.subr.bf16.mxu0 %v1976_v39  ;;  %1822 = vmatpush3.bf16.msra.mxu1 %v1975_v40 }
  0x56   :  { %1823 = vmatprep.subr.bf16.mxu1 %v1977_v42 }
  0x58   :  { %1802 = vmatpush3.bf16.msra.mxu0 %v1978_v43 }
  0x59   :  { %1803 = vmatprep.subr.bf16.mxu0 %v1980_v44  ;;  %1824 = vmatpush3.bf16.msra.mxu1 %v1979_v46 }
  0x5a   :  { %1825 = vmatprep.subr.bf16.mxu1 %v1981_v49 }
  0x5c   :  { %1804 = vmatpush3.bf16.msra.mxu0 %v1982_v50 }
  0x5d   :  { %1805 = vmatprep.subr.bf16.mxu0 %v1984_v53  ;;  %1826 = vmatpush3.bf16.msra.mxu1 %v1983_v54 }
  0x5e   :  { %1827 = vmatprep.subr.bf16.mxu1 %v1985_v57 }
  0x60   :  { %1806 = vmatpush3.bf16.msra.mxu0 %v1986_v58 }
  0x61   :  { %1835 = vmatprep.subr.bf16.mxu0 %v1988_v61  ;;  %1828 = vmatpush3.bf16.msra.mxu1 %v1987_v62 }
  0x62   :  { %1857 = vmatprep.subr.bf16.mxu1 %v1989_v0 }
  0x63   :  { %1364 = vmatmul.mubr.bf16.vlgmr.msra.gmra.mrb[8].mxu0 %v361_v60 }
  0x64   :  { %1836 = vmatpush3.bf16.msra.mxu0 %v1990_v1  ;;  %1443 = vmatprep.mubr.bf16.mxu0 %v382_v63 }
  0x65   :  { %1404 = vmatmul.mubr.bf16.vlgmr.msra.gmra.mrb[8].mxu1 %v383_v2  ;;  %1837 = vmatprep.subr.bf16.mxu0 %v1992_v3 }
  0x66   :  { %1858 = vmatpush3.bf16.msra.mxu1 %v1991_v4  ;;  %1483 = vmatprep.mubr.bf16.mxu1 %v386_v5 }
  0x67   :  { %1859 = vmatprep.subr.bf16.mxu1 %v1993_v6 }
  0x68   :  { %1838 = vmatpush3.bf16.msra.mxu0 %v1994_v7 }
  0x69   :  { %1839 = vmatprep.subr.bf16.mxu0 %v1996_v8 }
  0x6a   :  { %1860 = vmatpush3.bf16.msra.mxu1 %v1995_v9 }
  0x6b   :  { %1861 = vmatprep.subr.bf16.mxu1 %v1997_v10 }
  0x6c   :  { %1840 = vmatpush3.bf16.msra.mxu0 %v1998_v11 }
  0x6d   :  { %1841 = vmatprep.subr.bf16.mxu0 %v2000_v12 }
  0x6e   :  { %1862 = vmatpush3.bf16.msra.mxu1 %v1999_v13 }
  0x6f   :  { %1863 = vmatprep.subr.bf16.mxu1 %v2001_v14 }
  0x70   :  { %1842 = vmatpush3.bf16.msra.mxu0 %v2002_v15 }
  0x71   :  { %1843 = vmatprep.subr.bf16.mxu0 %v2004_v16 }
  0x72   :  { %1864 = vmatpush3.bf16.msra.mxu1 %v2003_v17 }
  0x73   :  { %1865 = vmatprep.subr.bf16.mxu1 %v2005_v18 }
  0x74   :  { %1844 = vmatpush3.bf16.msra.mxu0 %v2006_v19 }
  0x75   :  { %1845 = vmatprep.subr.bf16.mxu0 %v2008_v20 }
  0x76   :  { %1866 = vmatpush3.bf16.msra.mxu1 %v2007_v21 }
  0x77   :  { %10 = vsyncpa [#allocation3], 0  ;;  %1867 = vmatprep.subr.bf16.mxu1 %v2009_v22  ;;  %v2013_v26 = vld [vmem:[%s2516_s1 + $0x3f0] sm:$0xff]   ;;  %v2016_v28 = vld [vmem:[%s2516_s1 + $0x378] sm:$0xff]   ;;  %v368_v32 = vrot.slane %v2374_v52, %v2185_v41  ;;  %vm1511_vm0 = vcmask 1044480   ;;  %v2047_v36 = vmov 0.0  }
  0x78   :  { %1846 = vmatpush3.bf16.msra.mxu0 %v2010_v23  ;;  %v2014_v27 = vld [vmem:[%s2516_s1 + $0x330] sm:$0xff]   ;;  %v2017_v30 = vld [vmem:[%s2516_s1 + $0x3f8] sm:$0xff]   ;;  %v2021_v35 = vld [vmem:[%s2518_s3] sm:$0x1f]   ;;  %vm2048_vm1 = vmmov 0   ;;  %vm1507_vm2 = vcmask 80896  }
  0x79   :  { %1847 = vmatprep.subr.bf16.mxu0 %v2012_v24  ;;  %v2015_v29 = vld [vmem:[%s2516_s1 + $0x3b0] sm:$0xff]   ;;  %v2018_v31 = vld [vmem:[%s2516_s1 + $0x338] sm:$0xff]   ;;  %v384_v34 = vcombine.high %v368_v32, %v368_v32  ;;  %v1513_v37 = vsel %vm1511_vm0, %v2021_v35, 0  ;;  %v1571_v38 = vld [vmem:[%s2517_s2] ss:$0 sm:$0xff]  ;;  %s2049_s28 = smov [#allocation2]  }
  0x7a   :  { %1868 = vmatpush3.bf16.msra.mxu1 %v2011_v25  ;;  %v2019_v33 = vld [vmem:[%s2516_s1 + $0x3b8] sm:$0xff]   ;;  %v1700_v25 = vld [vmem:[%s2519_s4] ss:$0 sm:$0xff]  ;;  %s1563_s0 = sshll.u32 %s2049_s28, 4  ;;  %vm1555_vm3 = vcmask 74752   ;;  %s1564_s0 = int_to_ptr.vmem [resolvable:$true] %s1563_s0 }
  0x7b   :  { %1869 = vmatprep.subr.bf16.mxu1 %v2013_v26  ;;  %s2022_s29 = scalar_lea.vmem %s1564_s0, 32  ;;  %p2027_p1 = scmp.lt.s32.totalorder %s1564_s0, %s1564_s0 }
  0x7c   :  { %1848 = vmatpush3.bf16.msra.mxu0 %v2014_v27  ;;  %p2023_p0 = scmp.ne.s32.totalorder %s1564_s0, %s2022_s29  ;;  %p2028_p2 = scmp.lt.s32.totalorder %s2022_s29, %s2022_s29 }
  0x7d   :  { %1849 = vmatprep.subr.bf16.mxu0 %v2016_v28 }
  0x7e   :  { %1870 = vmatpush3.bf16.msra.mxu1 %v2015_v29  ;;  %p2029_p3 = por %p2028_p2, %p2027_p1 }
  0x7f   :  { %1871 = vmatprep.subr.bf16.mxu1 %v2017_v30 }
  0x80   :  { %1850 = vmatpush3.bf16.msra.mxu0 %v2018_v31  ;;  %p2030_p4 = pnand %p2029_p3, %p2023_p0 }
  0x81   :  { %1881 = vmatprep.subr.bf16.mxu0 %v2047_v36 }
  0x82   :  { %1872 = vmatpush3.bf16.msra.mxu1 %v2019_v33 }
  0x83   :  { %1444 = vmatmul.mubr.bf16.vlgmr.msra.gmra.mrb[12].mxu0 %v368_v32 }
  0x84   :  { %1882 = vmatpush3.bf16.msra.mxu0 %v1513_v37  ;;  %1883 = vmatprep.mubr.msk.bf16.mxu0 %vm2048_vm1, %v2047_v36 }
  0x85   :  { %1484 = vmatmul.mubr.bf16.vlgmr.msra.gmra.mrb[12].mxu1 %v384_v34 }
  0xf6   :  { %v1719_v41 = vpop.f32.mrb[0].mxu0 }
  0xf7   :  { %v1720_v39 = vpop.f32.mrb[1].mxu0  ;;  %v1741_v40 = vpop.f32.mrb[0].mxu1 }
  0xf8   :  { %v1721_v42 = vadd.f32 %v1720_v39, %v1719_v41  ;;  %v1722_v43 = vpop.f32.mrb[2].mxu0  ;;  %v1742_v44 = vpop.f32.mrb[1].mxu1 }
  0xf9   :  { %v1723_v45 = vpop.f32.mrb[3].mxu0  ;;  %v1743_v47 = vadd.f32 %v1742_v44, %v1741_v40  ;;  %v1744_v48 = vpop.f32.mrb[2].mxu1 }
  0xfa   :  { %v1206_v46 = vadd.f32 %v1721_v42, %v1571_v38  ;;  %v1745_v49 = vpop.f32.mrb[3].mxu1 }
  0xfc   :  { %v1246_v50 = vadd.f32 %v1743_v47, %v1206_v46 }
 0x116   :  { %v1763_v51 = vpop.f32.mrb[4].mxu0 }
 0x117   :  { %v1764_v52 = vpop.f32.mrb[5].mxu0  ;;  %v1785_v53 = vpop.f32.mrb[4].mxu1 }
 0x118   :  { %v1765_v54 = vadd.f32 %v1764_v52, %v1763_v51  ;;  %v1766_v55 = vpop.f32.mrb[6].mxu0  ;;  %v1786_v56 = vpop.f32.mrb[5].mxu1 }
 0x119   :  { %v1767_v57 = vpop.f32.mrb[7].mxu0  ;;  %v1787_v59 = vadd.f32 %v1786_v56, %v1785_v53  ;;  %v1788_v60 = vpop.f32.mrb[6].mxu1 }
 0x11a   :  { %v1286_v58 = vadd.f32 %v1765_v54, %v1246_v50  ;;  %v1789_v61 = vpop.f32.mrb[7].mxu1 }
 0x11c   :  { %v1326_v62 = vadd.f32 %v1787_v59, %v1286_v58 }
 0x136   :  { %v1807_v63 = vpop.f32.mrb[8].mxu0 }
 0x137   :  { %v1808_v0 = vpop.f32.mrb[9].mxu0 }
 0x138   :  { %v1829_v1 = vpop.f32.mrb[8].mxu1  ;;  %v1809_v2 = vadd.f32 %v1808_v0, %v1807_v63  ;;  %v1810_v3 = vpop.f32.mrb[10].mxu0 }
 0x139   :  { %v1830_v4 = vpop.f32.mrb[9].mxu1  ;;  %v1811_v5 = vpop.f32.mrb[11].mxu0 }
 0x13a   :  { %v1366_v6 = vadd.f32 %v1809_v2, %v1326_v62  ;;  %v1831_v7 = vadd.f32 %v1830_v4, %v1829_v1  ;;  %v1832_v8 = vpop.f32.mrb[10].mxu1 }
 0x13b   :  { %v1833_v9 = vpop.f32.mrb[11].mxu1 }
 0x13c   :  { %v1406_v10 = vadd.f32 %v1831_v7, %v1366_v6 }
 0x156   :  { %v1851_v11 = vpop.f32.mrb[12].mxu0 }
 0x157   :  { %v1852_v12 = vpop.f32.mrb[13].mxu0 }
 0x158   :  { %v1873_v13 = vpop.f32.mrb[12].mxu1  ;;  %v1853_v14 = vadd.f32 %v1852_v12, %v1851_v11  ;;  %v1854_v15 = vpop.f32.mrb[14].mxu0 }
 0x159   :  { %v1874_v16 = vpop.f32.mrb[13].mxu1  ;;  %v1855_v17 = vpop.f32.mrb[15].mxu0 }
 0x15a   :  { %v1446_v18 = vadd.f32 %v1853_v14, %v1406_v10  ;;  %v1875_v19 = vadd.f32 %v1874_v16, %v1873_v13  ;;  %v1876_v20 = vpop.f32.mrb[14].mxu1 }
 0x15b   :  { %v1877_v21 = vpop.f32.mrb[15].mxu1 }
 0x15c   :  { %v1486_v22 = vadd.f32 %v1875_v19, %v1446_v18 }
 0x15e   :  { %v1491_v23 = vmax.f32 %v1486_v22, 0.0 }
 0x160   :  { %v1492_v24 = vpack.c.bf16 %v1491_v23, %v1491_v23 }
 0x162   :  { %1884 = vmatmul.mubr.msk.bf16.vlgmr.msra.gmra.mrb[16].mxu0 %vm1507_vm2, %v1492_v24 }
 0x235   :  { %v1549_v26 = vpop.f32.mrb[16].mxu0 }
 0x236   :  { %v1550_v27 = vadd.f32 %v1700_v25, %v1549_v26  ;;  %v1885_v28 = vpop.f32.mrb[17].mxu0 }
 0x237   :  { %v1552_v29 = vpop.f32.mrb[18].mxu0 }
 0x238   :  { %v1886_v30 = vpop.f32.mrb[19].mxu0  ;;  %1556 = vst.msk [vmem:[#allocation2] sm:$0x3] %vm1555_vm3, %v1550_v27 }
 0x239   :  { %2033 = shalt.err (!%p2030_p4)
}
 0x23a   :  { %s2034_s4 = scalar_lea.hbm %s2520_s5, 32 }
 0x23b   :  { %p2035_p5 = scmp.ne.s32.totalorder %s2520_s5, %s2034_s4  ;;  %p2038_p6 = scmp.lt.u32.totalorder %s2034_s4, %s2520_s5 }
 0x23d   :  { %p2040_p7 = pnand %p2038_p6, %p2035_p5 }
 0x23f   :  { %2043 = shalt.err (!%p2040_p7)
}
 0x240   :  { %1566 = dma.vmem_to_hbm [thread:$0]  %s1564_s0, 32, %s2520_s5, [#allocation3]  }
 0x241   :  { %2044 = dma.done.wait [#allocation3], 32  }
 0x242   :  { %2045 = vsyncadd [#allocation3], 4294967264 }
 0x243   :  { %1570 = vsyncpa [#allocation3], 1 }

</bundles_post_ra>
